<compile_context>
chip_gen: v7x
topology: tpu7x:2x2x1
jax: 0.10.0
libtpu: 0.0.40
codegen_flags: <defaults>
</compile_context>

<pallas_src>
import functools

import jax
import jax.numpy as jnp
from jax.experimental import pallas as pl
from jax.experimental.pallas import tpu as pltpu

EPS = 1e-5                 # nn.BatchNorm2d default eps


# ---------------------------------------------------------------------------
# Fused Pallas kernel:
#   conv1 -> BN1 -> ReLU -> conv2 -> BN2 -> (+x) -> ReLU
# Layout: activations are (C, P_pad) with P = N*Hp*Wp (lane-dense, zero halo
# per image, zero lane tail), so a 3x3 SAME conv tap is a static lane shift.
# ---------------------------------------------------------------------------
def fused_residual_block_kernel(x_ref, w1_ref, w2_ref, g1_ref, b1_ref,
                                g2_ref, b2_ref, out_ref,
                                *, Hp: int, Wp: int, H: int, W: int,
                                P: int, n_valid: int):
    # x_ref    : (Cin, P_pad)  f32   zero-padded, transposed, flattened input
    # w*_ref   : (Cout, 9*Cin) / (Cout, 9*Cout)  f32  folded conv weights
    # g*/b*_ref: (Cout, 1) f32   BN affine params
    # out_ref  : (Cout, P_pad) f32  (halo / lane-tail columns hold garbage)
    x = x_ref[...]                       # (Cin, P_pad)
    P_pad = x.shape[-1]
    inv_n = 1.0 / float(n_valid)

    # ---- validity mask generated in-kernel (no HBM DMA) -------------------
    # Decompose the flat lane index p = n*Hp*Wp + h*Wp + w in f32.  All
    # quantities are exact in f32 for the sizes used here (< 2^24); the +0.5
    # keeps the true quotient >= 0.5/divisor away from an integer, so floor of
    # the (slightly rounded) f32 division equals the exact integer division.
    idx = jax.lax.broadcasted_iota(jnp.int32, (1, P_pad), 1).astype(jnp.float32)
    img_sz = float(Hp * Wp)
    n_img = jnp.floor((idx + 0.5) / img_sz)
    rem = idx - n_img * img_sz
    hh = jnp.floor((rem + 0.5) / float(Wp))
    ww = rem - hh * float(Wp)
    mask = ((idx < float(P))
            & (hh >= 1.0) & (hh <= float(H))
            & (ww >= 1.0) & (ww <= float(W))).astype(jnp.float32)   # (1, P_pad)

    # Ones column used to do the BN lane reductions on the MXU.
    ones_col = jnp.ones((P_pad, 1), jnp.float32)

    def make_taps(a):
        # Implicit im2col: 9 lane-shifted copies stacked along the contraction
        # axis.  pltpu.roll uses the XLU slot -> nearly free next to the MXU.
        parts = []
        for kh in range(3):
            for kw in range(3):
                d = (kh - 1) * Wp + (kw - 1)       # tap[p] = a[p + d]
                s = (-d) % P_pad                   # static, non-negative shift
                parts.append(a if s == 0 else pltpu.roll(a, shift=s, axis=1))
        return jnp.concatenate(parts, axis=0)      # (9*C, P_pad)

    def conv_bn(a, w_ref, g_ref, b_ref):
        # One K = 9*C matmul, f32 accumulation, lane-dense (Cout, P_pad) result.
        acc = jnp.dot(w_ref[...], make_taps(a),
                      preferred_element_type=jnp.float32)           # (Cout, P_pad)
        acc_m = acc * mask               # zero halo/tail -> stats see only valid px
        # BatchNorm2d (training mode): biased batch stats over the N*H*W valid
        # pixels.  Row sums done on the MXU (ones-column matmuls), rsqrt on EUP.
        s1 = jnp.dot(acc_m, ones_col, preferred_element_type=jnp.float32)
        s2 = jnp.dot(acc_m * acc_m, ones_col, preferred_element_type=jnp.float32)
        mean = s1 * inv_n                                            # (Cout, 1)
        var = s2 * inv_n - mean * mean
        # Fold BN into per-channel scale/shift, then a single broadcast FMA-ish
        # pass over the (Cout, P_pad) array.
        scale = g_ref[...] * jax.lax.rsqrt(var + EPS)                # (Cout, 1)
        shift = b_ref[...] - mean * scale                            # (Cout, 1)
        return acc_m * scale + shift     # halo/tail columns hold `shift` garbage

    # Stage 1: conv1 -> BN1 -> ReLU.  Re-mask so halo pixels are exactly zero
    # (this *is* the SAME zero-padding that stage 2's conv needs).
    h1 = jnp.maximum(conv_bn(x, w1_ref, g1_ref, b1_ref), 0.0) * mask

    # Stage 2: conv2 -> BN2 -> (+ identity residual) -> ReLU.  No final mask:
    # the wrapper only reads interior pixels (documented invariant).
    y2 = conv_bn(h1, w2_ref, g2_ref, b2_ref)
    out_ref[...] = jnp.maximum(y2 + x, 0.0)


# ---------------------------------------------------------------------------
# Wrapper: layout plumbing only (one pad + transpose in, one slice out).
# ---------------------------------------------------------------------------
@jax.jit
def residual_block(x_nchw, params):
    """Forward pass of ResidualBlock (stride=1, shortcut=None). Input NCHW."""
    x = x_nchw.astype(jnp.float32)
    N, Cin, H, W = x.shape
    Cout = params["w1"].shape[-1]
    if Cin != Cout:
        # TODO(synk): identity shortcut requires inchannel == outchannel.
        raise NotImplementedError("identity shortcut needs Cin == Cout")

    Hp, Wp = H + 2, W + 2
    P = N * Hp * Wp
    P_pad = ((P + 127) // 128) * 128          # lane-dense last dimension

    # (N,C,H,W) -> zero halo -> (C, N*Hp*Wp) -> pad lanes to P_pad.
    xp = jnp.pad(x, ((0, 0), (0, 0), (1, 1), (1, 1)))            # (N,C,Hp,Wp)
    xp = jnp.transpose(xp, (1, 0, 2, 3)).reshape(Cin, P)
    xp = jnp.pad(xp, ((0, 0), (0, P_pad - P)))

    # Fold the 3x3 taps into the contraction dim: HWIO (3,3,Ci,Co) -> (Co, 9*Ci).
    w1 = params["w1"].reshape(9 * Cin, Cout).T.astype(jnp.float32)
    w2 = params["w2"].reshape(9 * Cout, Cout).T.astype(jnp.float32)
    g1 = params["g1"].reshape(Cout, 1).astype(jnp.float32)
    b1 = params["b1"].reshape(Cout, 1).astype(jnp.float32)
    g2 = params["g2"].reshape(Cout, 1).astype(jnp.float32)
    b2 = params["b2"].reshape(Cout, 1).astype(jnp.float32)

    kernel = functools.partial(fused_residual_block_kernel,
                               Hp=Hp, Wp=Wp, H=H, W=W, P=P, n_valid=N * H * W)

    # Advisory cost estimate: 2 conv matmuls + 4 reduction matmuls + pointwise.
    conv_flops = 2 * P_pad * (Cout * 9 * Cin + Cout * 9 * Cout)
    red_flops = 4 * 2 * P_pad * Cout
    cost = pl.CostEstimate(
        flops=int(conv_flops + red_flops + 12 * Cout * P_pad),
        transcendentals=int(2 * Cout),
        bytes_accessed=int(4 * ((Cin + Cout) * P_pad + w1.size + w2.size + 4 * Cout)))

    vmem = pl.BlockSpec(memory_space=pltpu.MemorySpace.VMEM)
    out_t = pl.pallas_call(
        kernel,
        out_shape=jax.ShapeDtypeStruct((Cout, P_pad), jnp.float32),
        in_specs=[vmem] * 7,
        out_specs=vmem,
        cost_estimate=cost,
    )(xp, w1, w2, g1, b1, g2, b2)

    # (Cout, P_pad) -> interior pixels only (halo/tail columns are garbage
    # by design) -> NCHW.
    out = out_t[:, :P].reshape(Cout, N, Hp, Wp)[:, :, 1:H + 1, 1:W + 1]
    return jnp.transpose(out, (1, 0, 2, 3))


# ---------------------------------------------------------------------------
# Pure-JAX reference (correctness check), all f32 like the kernel.
# ---------------------------------------------------------------------------
def _ref_block(x_nchw, params):
    x = jnp.transpose(x_nchw, (0, 2, 3, 1)).astype(jnp.float32)   # NHWC

    def conv(h, w):   # w: HWIO
        return jax.lax.conv_general_dilated(
            h, w, (1, 1), "SAME",
            dimension_numbers=("NHWC", "HWIO", "NHWC"),
            preferred_element_type=jnp.float32)

    def bn(h, g, b):
        m = h.mean(axis=(0, 1, 2), keepdims=True)
        v = ((h - m) ** 2).mean(axis=(0, 1, 2), keepdims=True)
        return (h - m) * jax.lax.rsqrt(v + EPS) * g.reshape(1, 1, 1, -1) \
            + b.reshape(1, 1, 1, -1)

    h = jax.nn.relu(bn(conv(x, params["w1"]), params["g1"], params["b1"]))
    o = bn(conv(h, params["w2"]), params["g2"], params["b2"]) + x
    return jnp.transpose(jax.nn.relu(o), (0, 3, 1, 2))


# ---------------------------------------------------------------------------
if __name__ == "__main__":
    key = jax.random.PRNGKey(0)
    N, C, H, W = 2, 8, 16, 16          # inchannel == outchannel, stride = 1
    k_x, k_w1, k_w2 = jax.random.split(key, 3)

    x = jax.random.normal(k_x, (N, C, H, W), jnp.float32)

    # Conv weights in HWIO layout; BN gamma=1, beta=0 (PyTorch default init).
    params = {
        "w1": 0.1 * jax.random.normal(k_w1, (3, 3, C, C), jnp.float32),
        "w2": 0.1 * jax.random.normal(k_w2, (3, 3, C, C), jnp.float32),
        "g1": jnp.ones((C,), jnp.float32),
        "b1": jnp.zeros((C,), jnp.float32),
        "g2": jnp.ones((C,), jnp.float32),
        "b2": jnp.zeros((C,), jnp.float32),
    }

    out = jax.block_until_ready(residual_block(x, params))
    ref = jax.block_until_ready(_ref_block(x, params))

    assert out.shape == (N, C, H, W)
    assert bool(jnp.all(out >= 0.0))
    err = float(jnp.max(jnp.abs(out - ref)))
    assert err < 1e-3, f"max err {err}"

    print("KERNEL_OK")
</pallas_src>

<mosaic_0001>
module attributes {stable_mosaic.version = 11 : i64} {
  func.func @fused_residual_block_kernel(%arg0: memref<8x768xf32, #tpu.memory_space<vmem>>, %arg1: memref<8x72xf32, #tpu.memory_space<vmem>>, %arg2: memref<8x72xf32, #tpu.memory_space<vmem>>, %arg3: memref<8x1xf32, #tpu.memory_space<vmem>>, %arg4: memref<8x1xf32, #tpu.memory_space<vmem>>, %arg5: memref<8x1xf32, #tpu.memory_space<vmem>>, %arg6: memref<8x1xf32, #tpu.memory_space<vmem>>, %arg7: memref<8x768xf32, #tpu.memory_space<vmem>>) attributes {dimension_semantics = [], scalar_prefetch = 0 : i64, scratch_operands = 0 : i64, tpu.core_type = #tpu.core_type<tc>} {
    %c0 = arith.constant 0 : index
    %c0_0 = arith.constant 0 : index
    %0 = vector.load %arg0[%c0, %c0_0] : memref<8x768xf32, #tpu.memory_space<vmem>>, vector<8x768xf32>
    %1 = tpu.iota {dimensions = array<i32: 1>} : vector<1x768xi32>
    %2 = arith.sitofp %1 : vector<1x768xi32> to vector<1x768xf32>
    %cst = arith.constant 5.000000e-01 : f32
    %3 = vector.broadcast %cst : f32 to vector<1x768xf32>
    %4 = arith.addf %2, %3 : vector<1x768xf32>
    %cst_1 = arith.constant 3.240000e+02 : f32
    %5 = vector.broadcast %cst_1 : f32 to vector<1x768xf32>
    %6 = arith.divf %4, %5 : vector<1x768xf32>
    %7 = math.floor %6 : vector<1x768xf32>
    %cst_2 = arith.constant 3.240000e+02 : f32
    %8 = vector.broadcast %cst_2 : f32 to vector<1x768xf32>
    %9 = arith.mulf %7, %8 : vector<1x768xf32>
    %10 = arith.subf %2, %9 : vector<1x768xf32>
    %cst_3 = arith.constant 5.000000e-01 : f32
    %11 = vector.broadcast %cst_3 : f32 to vector<1x768xf32>
    %12 = arith.addf %10, %11 : vector<1x768xf32>
    %cst_4 = arith.constant 1.800000e+01 : f32
    %13 = vector.broadcast %cst_4 : f32 to vector<1x768xf32>
    %14 = arith.divf %12, %13 : vector<1x768xf32>
    %15 = math.floor %14 : vector<1x768xf32>
    %cst_5 = arith.constant 1.800000e+01 : f32
    %16 = vector.broadcast %cst_5 : f32 to vector<1x768xf32>
    %17 = arith.mulf %15, %16 : vector<1x768xf32>
    %18 = arith.subf %10, %17 : vector<1x768xf32>
    %cst_6 = arith.constant 6.480000e+02 : f32
    %19 = vector.broadcast %cst_6 : f32 to vector<1x768xf32>
    %20 = arith.cmpf olt, %2, %19 : vector<1x768xf32>
    %cst_7 = arith.constant 1.000000e+00 : f32
    %21 = vector.broadcast %cst_7 : f32 to vector<1x768xf32>
    %22 = arith.cmpf oge, %15, %21 : vector<1x768xf32>
    %23 = arith.andi %20, %22 : vector<1x768xi1>
    %cst_8 = arith.constant 1.600000e+01 : f32
    %24 = vector.broadcast %cst_8 : f32 to vector<1x768xf32>
    %25 = arith.cmpf ole, %15, %24 : vector<1x768xf32>
    %26 = arith.andi %23, %25 : vector<1x768xi1>
    %cst_9 = arith.constant 1.000000e+00 : f32
    %27 = vector.broadcast %cst_9 : f32 to vector<1x768xf32>
    %28 = arith.cmpf oge, %18, %27 : vector<1x768xf32>
    %29 = arith.andi %26, %28 : vector<1x768xi1>
    %cst_10 = arith.constant 1.600000e+01 : f32
    %30 = vector.broadcast %cst_10 : f32 to vector<1x768xf32>
    %31 = arith.cmpf ole, %18, %30 : vector<1x768xf32>
    %32 = arith.andi %29, %31 : vector<1x768xi1>
    %33 = arith.extui %32 : vector<1x768xi1> to vector<1x768xi32>
    %34 = arith.sitofp %33 : vector<1x768xi32> to vector<1x768xf32>
    %cst_11 = arith.constant 1.000000e+00 : f32
    %35 = vector.broadcast %cst_11 : f32 to vector<768x1xf32>
    %c0_12 = arith.constant 0 : index
    %c0_13 = arith.constant 0 : index
    %36 = vector.load %arg1[%c0_12, %c0_13] : memref<8x72xf32, #tpu.memory_space<vmem>>, vector<8x72xf32>
    %c19_i32 = arith.constant 19 : i32
    %37 = tpu.dynamic_rotate %0 by %c19_i32 dim 1 : vector<8x768xf32>, i32 -> vector<8x768xf32>
    %c18_i32 = arith.constant 18 : i32
    %38 = tpu.dynamic_rotate %0 by %c18_i32 dim 1 : vector<8x768xf32>, i32 -> vector<8x768xf32>
    %c17_i32 = arith.constant 17 : i32
    %39 = tpu.dynamic_rotate %0 by %c17_i32 dim 1 : vector<8x768xf32>, i32 -> vector<8x768xf32>
    %c1_i32 = arith.constant 1 : i32
    %40 = tpu.dynamic_rotate %0 by %c1_i32 dim 1 : vector<8x768xf32>, i32 -> vector<8x768xf32>
    %c767_i32 = arith.constant 767 : i32
    %41 = tpu.dynamic_rotate %0 by %c767_i32 dim 1 : vector<8x768xf32>, i32 -> vector<8x768xf32>
    %c751_i32 = arith.constant 751 : i32
    %42 = tpu.dynamic_rotate %0 by %c751_i32 dim 1 : vector<8x768xf32>, i32 -> vector<8x768xf32>
    %c750_i32 = arith.constant 750 : i32
    %43 = tpu.dynamic_rotate %0 by %c750_i32 dim 1 : vector<8x768xf32>, i32 -> vector<8x768xf32>
    %c749_i32 = arith.constant 749 : i32
    %44 = tpu.dynamic_rotate %0 by %c749_i32 dim 1 : vector<8x768xf32>, i32 -> vector<8x768xf32>
    %45 = tpu.concatenate %37, %38, %39, %40, %0, %41, %42, %43, %44 in 0 : vector<8x768xf32>, vector<8x768xf32>, vector<8x768xf32>, vector<8x768xf32>, vector<8x768xf32>, vector<8x768xf32>, vector<8x768xf32>, vector<8x768xf32>, vector<8x768xf32> -> vector<72x768xf32>
    %cst_14 = arith.constant dense<0.000000e+00> : vector<8x768xf32>
    %46 = tpu.matmul %36, %45, %cst_14 {dimension_numbers = #tpu.dot_dimension_numbers<[1], [0], [0], [1], [0, 0, 1, 1], [], []>} : vector<8x72xf32>, vector<72x768xf32>, vector<8x768xf32> -> vector<8x768xf32>
    %47 = vector.broadcast %34 : vector<1x768xf32> to vector<8x768xf32>
    %48 = arith.mulf %46, %47 : vector<8x768xf32>
    %cst_15 = arith.constant dense<0.000000e+00> : vector<8x1xf32>
    %49 = tpu.matmul %48, %35, %cst_15 {dimension_numbers = #tpu.dot_dimension_numbers<[1], [0], [0], [1], [0, 0, 1, 1], [], []>} : vector<8x768xf32>, vector<768x1xf32>, vector<8x1xf32> -> vector<8x1xf32>
    %50 = arith.mulf %48, %48 : vector<8x768xf32>
    %cst_16 = arith.constant dense<0.000000e+00> : vector<8x1xf32>
    %51 = tpu.matmul %50, %35, %cst_16 {dimension_numbers = #tpu.dot_dimension_numbers<[1], [0], [0], [1], [0, 0, 1, 1], [], []>} : vector<8x768xf32>, vector<768x1xf32>, vector<8x1xf32> -> vector<8x1xf32>
    %cst_17 = arith.constant 0.001953125 : f32
    %52 = vector.broadcast %cst_17 : f32 to vector<8x1xf32>
    %53 = arith.mulf %49, %52 : vector<8x1xf32>
    %cst_18 = arith.constant 0.001953125 : f32
    %54 = vector.broadcast %cst_18 : f32 to vector<8x1xf32>
    %55 = arith.mulf %51, %54 : vector<8x1xf32>
    %56 = arith.mulf %53, %53 : vector<8x1xf32>
    %57 = arith.subf %55, %56 : vector<8x1xf32>
    %c0_19 = arith.constant 0 : index
    %c0_20 = arith.constant 0 : index
    %58 = vector.load %arg3[%c0_19, %c0_20] : memref<8x1xf32, #tpu.memory_space<vmem>>, vector<8x1xf32>
    %cst_21 = arith.constant 9.99999974E-6 : f32
    %59 = vector.broadcast %cst_21 : f32 to vector<8x1xf32>
    %60 = arith.addf %57, %59 : vector<8x1xf32>
    %61 = math.rsqrt %60 : vector<8x1xf32>
    %62 = arith.mulf %58, %61 : vector<8x1xf32>
    %c0_22 = arith.constant 0 : index
    %c0_23 = arith.constant 0 : index
    %63 = vector.load %arg4[%c0_22, %c0_23] : memref<8x1xf32, #tpu.memory_space<vmem>>, vector<8x1xf32>
    %64 = arith.mulf %53, %62 : vector<8x1xf32>
    %65 = arith.subf %63, %64 : vector<8x1xf32>
    %66 = vector.broadcast %62 : vector<8x1xf32> to vector<8x768xf32>
    %67 = arith.mulf %48, %66 : vector<8x768xf32>
    %68 = vector.broadcast %65 : vector<8x1xf32> to vector<8x768xf32>
    %69 = arith.addf %67, %68 : vector<8x768xf32>
    %cst_24 = arith.constant 0.000000e+00 : f32
    %70 = vector.broadcast %cst_24 : f32 to vector<8x768xf32>
    %71 = arith.maximumf %69, %70 : vector<8x768xf32>
    %72 = vector.broadcast %34 : vector<1x768xf32> to vector<8x768xf32>
    %73 = arith.mulf %71, %72 : vector<8x768xf32>
    %c0_25 = arith.constant 0 : index
    %c0_26 = arith.constant 0 : index
    %74 = vector.load %arg2[%c0_25, %c0_26] : memref<8x72xf32, #tpu.memory_space<vmem>>, vector<8x72xf32>
    %c19_i32_27 = arith.constant 19 : i32
    %75 = tpu.dynamic_rotate %73 by %c19_i32_27 dim 1 : vector<8x768xf32>, i32 -> vector<8x768xf32>
    %c18_i32_28 = arith.constant 18 : i32
    %76 = tpu.dynamic_rotate %73 by %c18_i32_28 dim 1 : vector<8x768xf32>, i32 -> vector<8x768xf32>
    %c17_i32_29 = arith.constant 17 : i32
    %77 = tpu.dynamic_rotate %73 by %c17_i32_29 dim 1 : vector<8x768xf32>, i32 -> vector<8x768xf32>
    %c1_i32_30 = arith.constant 1 : i32
    %78 = tpu.dynamic_rotate %73 by %c1_i32_30 dim 1 : vector<8x768xf32>, i32 -> vector<8x768xf32>
    %c767_i32_31 = arith.constant 767 : i32
    %79 = tpu.dynamic_rotate %73 by %c767_i32_31 dim 1 : vector<8x768xf32>, i32 -> vector<8x768xf32>
    %c751_i32_32 = arith.constant 751 : i32
    %80 = tpu.dynamic_rotate %73 by %c751_i32_32 dim 1 : vector<8x768xf32>, i32 -> vector<8x768xf32>
    %c750_i32_33 = arith.constant 750 : i32
    %81 = tpu.dynamic_rotate %73 by %c750_i32_33 dim 1 : vector<8x768xf32>, i32 -> vector<8x768xf32>
    %c749_i32_34 = arith.constant 749 : i32
    %82 = tpu.dynamic_rotate %73 by %c749_i32_34 dim 1 : vector<8x768xf32>, i32 -> vector<8x768xf32>
    %83 = tpu.concatenate %75, %76, %77, %78, %73, %79, %80, %81, %82 in 0 : vector<8x768xf32>, vector<8x768xf32>, vector<8x768xf32>, vector<8x768xf32>, vector<8x768xf32>, vector<8x768xf32>, vector<8x768xf32>, vector<8x768xf32>, vector<8x768xf32> -> vector<72x768xf32>
    %cst_35 = arith.constant dense<0.000000e+00> : vector<8x768xf32>
    %84 = tpu.matmul %74, %83, %cst_35 {dimension_numbers = #tpu.dot_dimension_numbers<[1], [0], [0], [1], [0, 0, 1, 1], [], []>} : vector<8x72xf32>, vector<72x768xf32>, vector<8x768xf32> -> vector<8x768xf32>
    %85 = vector.broadcast %34 : vector<1x768xf32> to vector<8x768xf32>
    %86 = arith.mulf %84, %85 : vector<8x768xf32>
    %cst_36 = arith.constant dense<0.000000e+00> : vector<8x1xf32>
    %87 = tpu.matmul %86, %35, %cst_36 {dimension_numbers = #tpu.dot_dimension_numbers<[1], [0], [0], [1], [0, 0, 1, 1], [], []>} : vector<8x768xf32>, vector<768x1xf32>, vector<8x1xf32> -> vector<8x1xf32>
    %88 = arith.mulf %86, %86 : vector<8x768xf32>
    %cst_37 = arith.constant dense<0.000000e+00> : vector<8x1xf32>
    %89 = tpu.matmul %88, %35, %cst_37 {dimension_numbers = #tpu.dot_dimension_numbers<[1], [0], [0], [1], [0, 0, 1, 1], [], []>} : vector<8x768xf32>, vector<768x1xf32>, vector<8x1xf32> -> vector<8x1xf32>
    %cst_38 = arith.constant 0.001953125 : f32
    %90 = vector.broadcast %cst_38 : f32 to vector<8x1xf32>
    %91 = arith.mulf %87, %90 : vector<8x1xf32>
    %cst_39 = arith.constant 0.001953125 : f32
    %92 = vector.broadcast %cst_39 : f32 to vector<8x1xf32>
    %93 = arith.mulf %89, %92 : vector<8x1xf32>
    %94 = arith.mulf %91, %91 : vector<8x1xf32>
    %95 = arith.subf %93, %94 : vector<8x1xf32>
    %c0_40 = arith.constant 0 : index
    %c0_41 = arith.constant 0 : index
    %96 = vector.load %arg5[%c0_40, %c0_41] : memref<8x1xf32, #tpu.memory_space<vmem>>, vector<8x1xf32>
    %cst_42 = arith.constant 9.99999974E-6 : f32
    %97 = vector.broadcast %cst_42 : f32 to vector<8x1xf32>
    %98 = arith.addf %95, %97 : vector<8x1xf32>
    %99 = math.rsqrt %98 : vector<8x1xf32>
    %100 = arith.mulf %96, %99 : vector<8x1xf32>
    %c0_43 = arith.constant 0 : index
    %c0_44 = arith.constant 0 : index
    %101 = vector.load %arg6[%c0_43, %c0_44] : memref<8x1xf32, #tpu.memory_space<vmem>>, vector<8x1xf32>
    %102 = arith.mulf %91, %100 : vector<8x1xf32>
    %103 = arith.subf %101, %102 : vector<8x1xf32>
    %104 = vector.broadcast %100 : vector<8x1xf32> to vector<8x768xf32>
    %105 = arith.mulf %86, %104 : vector<8x768xf32>
    %106 = vector.broadcast %103 : vector<8x1xf32> to vector<8x768xf32>
    %107 = arith.addf %105, %106 : vector<8x768xf32>
    %108 = arith.addf %107, %0 : vector<8x768xf32>
    %cst_45 = arith.constant 0.000000e+00 : f32
    %109 = vector.broadcast %cst_45 : f32 to vector<8x768xf32>
    %110 = arith.maximumf %108, %109 : vector<8x768xf32>
    %c0_46 = arith.constant 0 : index
    %c0_47 = arith.constant 0 : index
    %111 = vector.load %arg7[%c0_46, %c0_47] : memref<8x768xf32, #tpu.memory_space<vmem>>, vector<8x768xf32>
    tpu.vector_store %arg7[%c0_46, %c0_47], %110 {strides = array<i32>} : memref<8x768xf32, #tpu.memory_space<vmem>>, vector<8x768xf32>,
    return
  }
}

</mosaic_0001>

<bundles_post_ra>
// kernel: residual_block.1
= control target key start
LH: loop header
LB: loop body
LE: loop exit
PB: predicated region body
PF: predicated region fallthrough
CT: control target
= control target key end

     0   :  { %s2751_s9 = smov 19   ;;  %s2752_s10 = smov 18   ;;  %v2758_v10 = vmov 0.0   ;;  %v32_v11 = vlaneseq  ;;  %vm3774_vm8 = vcmask 588800   ;;  %s3766_s0 = inlined_call_operand.vmem [shape: f32[8,768], index: 0, kind: input, shape index: {}]   ;;  %s3767_s1 = inlined_call_operand.vmem [shape: f32[8,72], index: 1, kind: input, shape index: {}]   ;;  %s3768_s3 = inlined_call_operand.vmem [shape: f32[8,1], index: 3, kind: input, shape index: {}]   ;;  %s3769_s4 = inlined_call_operand.vmem [shape: f32[8,1], index: 4, kind: input, shape index: {}]   ;;  %s3770_s2 = inlined_call_operand.vmem [shape: f32[8,72], index: 2, kind: input, shape index: {}]   ;;  %s3771_s5 = inlined_call_operand.vmem [shape: f32[8,1], index: 5, kind: input, shape index: {}]   ;;  %s3772_s6 = inlined_call_operand.vmem [shape: f32[8,1], index: 6, kind: input, shape index: {}]   ;;  %s3773_s7 = inlined_call_operand.vmem [shape: f32[8,768], index: 7, kind: output, shape index: {}]  }
   0x1   :  { %v2805_v0 = vld [vmem:[%s3766_s0 + $0x10] sm:$0xff]  ;;  %v2810_v1 = vld [vmem:[%s3766_s0 + $0x28] sm:$0xff]  ;;  %v2815_v2 = vld [vmem:[%s3766_s0] sm:$0xff]  ;;  %s2753_s13 = smov 1   ;;  %s2754_s14 = smov 17   ;;  %394 = vmatprep.mubr.f32.mxu0 %v2758_v10  ;;  %465 = vmatprep.mubr.f32.mxu1 %v2758_v10 }
   0x2   :  { %v2609_v3 = vpack.i.bf16 %v2805_v0, %v2810_v1  ;;  %v2822_v4 = vld [vmem:[%s3766_s0 + $0x8] sm:$0xff]  ;;  %v2833_v6 = vld [vmem:[%s3766_s0 + $0x18] sm:$0xff]  ;;  %s2755_s15 = smov 127   ;;  %v2856_v9 = vld [vmem:[%s3766_s0 + $0x20] sm:$0xff]  ;;  %s2756_s18 = smov 111   ;;  %v2898_v14 = vand.u32 127, %v32_v11 }
   0x3   :  { %v2599_v5 = vpack.i.bf16 %v2822_v4, %v2815_v2  ;;  %v2644_v7 = vpack.i.bf16 %v2833_v6, %v2815_v2  ;;  %v2639_v8 = vpack.i.bf16 %v2805_v0, %v2822_v4  ;;  %s2757_s19 = smov 110   ;;  %s2759_s20 = smov 109  }
   0x4   :  { %2610 = vrot.lane.b32.xlu1 %v2609_v3, %s2751_s9  ;;  %vm3782_vm0 = vcmp.lt.s32.totalorder %v2898_v14, 19  ;;  %vm3781_vm1 = vcmp.lt.s32.totalorder %v2898_v14, 18  ;;  %vm3779_vm2 = vcmp.lt.s32.totalorder %v2898_v14, 1  ;;  %vm3780_vm3 = vcmp.lt.s32.totalorder %v2898_v14, 17 }
   0x5   :  { %2600 = vrot.lane.b32.xlu0 %v2599_v5, %s2751_s9  ;;  %vm3778_vm4 = vcmp.lt.s32.totalorder %v2898_v14, 127  ;;  %vm3777_vm5 = vcmp.lt.s32.totalorder %v2898_v14, 111  ;;  %vm3776_vm6 = vcmp.lt.s32.totalorder %v2898_v14, 110  ;;  %vm3775_vm7 = vcmp.lt.s32.totalorder %v2898_v14, 109 }
   0x8   :  { %2615 = vrot.lane.b32.xlu1 %v2609_v3, %s2752_s10 }
   0x9   :  { %2605 = vrot.lane.b32.xlu0 %v2599_v5, %s2752_s10 }
   0xc   :  { %199 = vrot.lane.b32.xlu1 %v2833_v6, %s2752_s10 }
   0xd   :  { %180 = vrot.lane.b32.xlu0 %v2833_v6, %s2751_s9 }
  0x10   :  { %2625 = vrot.lane.b32.xlu1 %v2599_v5, %s2753_s13 }
  0x11   :  { %2620 = vrot.lane.b32.xlu0 %v2599_v5, %s2754_s14 }
  0x14   :  { %2635 = vrot.lane.b32.xlu1 %v2609_v3, %s2753_s13 }
  0x15   :  { %2630 = vrot.lane.b32.xlu0 %v2609_v3, %s2754_s14 }
  0x18   :  { %237 = vrot.lane.b32.xlu1 %v2833_v6, %s2753_s13 }
  0x19   :  { %218 = vrot.lane.b32.xlu0 %v2833_v6, %s2754_s14 }
  0x1c   :  { %2645 = vrot.lane.b32.xlu1 %v2644_v7, %s2755_s15 }
  0x1d   :  { %2640 = vrot.lane.b32.xlu0 %v2639_v8, %s2755_s15 }
  0x20   :  { %2650 = vrot.lane.b32.xlu1 %v2639_v8, %s2756_s18 }
  0x21   :  { %258 = vrot.lane.b32.xlu0 %v2856_v9, %s2755_s15 }
  0x24   :  { %2660 = vrot.lane.b32.xlu1 %v2644_v7, %s2756_s18 }
  0x25   :  { %2655 = vrot.lane.b32.xlu0 %v2639_v8, %s2757_s19 }
  0x28   :  { %277 = vrot.lane.b32.xlu1 %v2856_v9, %s2756_s18 }
  0x29   :  { %2665 = vrot.lane.b32.xlu0 %v2644_v7, %s2757_s19 }
  0x2c   :  { %309 = vrot.lane.b32.xlu1 %v2822_v4, %s2759_s20 }
  0x2d   :  { %296 = vrot.lane.b32.xlu0 %v2856_v9, %s2757_s19 }
  0x30   :  { %307 = vrot.lane.b32.xlu1 %v2815_v2, %s2759_s20 }
  0x31   :  { %311 = vrot.lane.b32.xlu0 %v2805_v0, %s2759_s20 }
  0x34   :  { %315 = vrot.lane.b32.xlu1 %v2856_v9, %s2759_s20 }
  0x35   :  { %313 = vrot.lane.b32.xlu0 %v2833_v6, %s2759_s20 }
  0x38   :  { %201 = vrot.lane.b32.xlu1 %v2856_v9, %s2752_s10 }
  0x39   :  { %182 = vrot.lane.b32.xlu0 %v2856_v9, %s2751_s9 }
  0x3c   :  { %239 = vrot.lane.b32.xlu1 %v2856_v9, %s2753_s13 }
  0x3d   :  { %220 = vrot.lane.b32.xlu0 %v2856_v9, %s2754_s14 }
  0x40   :  { %279 = vrot.lane.b32.xlu1 %v2810_v1, %s2756_s18 }
  0x41   :  { %260 = vrot.lane.b32.xlu0 %v2810_v1, %s2755_s15 }
  0x44   :  { %317 = vrot.lane.b32.xlu1 %v2810_v1, %s2759_s20 }
  0x45   :  { %298 = vrot.lane.b32.xlu0 %v2810_v1, %s2757_s19 }
  0x76   :  { %v2896_v12 = vpop.permute.xlu1 %2610 }
  0x77   :  { %v2601_v13 = vpop.permute.xlu0 %2600  ;;  %v2612_v15 = vunpack.i.l.bf16 %v2896_v12  ;;  %v2613_v24 = vunpack.i.h.bf16 %v2896_v12 }
  0x78   :  { %v2603_v16 = vunpack.i.h.bf16 %v2601_v13  ;;  %v2602_v17 = vunpack.i.l.bf16 %v2601_v13 }
  0x7a   :  { %v2901_v18 = vpop.permute.xlu1 %2615  ;;  %v191_v26 = vsel %vm3782_vm0, %v2602_v17, %v2603_v16  ;;  %v192_v28 = vsel %vm3782_vm0, %v2612_v15, %v2602_v17  ;;  %v190_v37 = vsel %vm3782_vm0, %v2603_v16, %v2613_v24 }
  0x7b   :  { %v2618_v19 = vunpack.i.h.bf16 %v2901_v18  ;;  %v2617_v20 = vunpack.i.l.bf16 %v2901_v18  ;;  %v2606_v21 = vpop.permute.xlu0 %2605 }
  0x7c   :  { %v2608_v22 = vunpack.i.h.bf16 %v2606_v21  ;;  %v2607_v23 = vunpack.i.l.bf16 %v2606_v21 }
  0x7e   :  { %v2908_v25 = vpop.permute.xlu1 %199  ;;  %v210_v27 = vsel %vm3781_vm1, %v2607_v23, %v2608_v22  ;;  %v211_v29 = vsel %vm3781_vm1, %v2617_v20, %v2607_v23  ;;  %v209_v34 = vsel %vm3781_vm1, %v2608_v22, %v2618_v19 }
  0x7f   :  { %v2922_v30 = vpop.permute.xlu0 %180  ;;  %v2300_v31 = vpack.c.bf16 %v210_v27, %v191_v26  ;;  %v2302_v32 = vpack.c.bf16 %v211_v29, %v192_v28  ;;  %v208_v33 = vsel %vm3781_vm1, %v2618_v19, %v2908_v25  ;;  %v2318_v39 = vpack.c.bf16 %v209_v34, %v190_v37 }
  0x80   :  { %v189_v35 = vsel %vm3782_vm0, %v2613_v24, %v2922_v30 }
  0x81   :  { %2301 = vmatprep.subr.bf16.mxu0 %v2300_v31  ;;  %v2316_v36 = vpack.c.bf16 %v208_v33, %v189_v35 }
  0x82   :  { %2303 = vmatpush1.bf16.msra.mxu0 %v2302_v32  ;;  %v2626_v38 = vpop.permute.xlu1 %2625 }
  0x83   :  { %v2628_v40 = vunpack.i.h.bf16 %v2626_v38  ;;  %v2627_v41 = vunpack.i.l.bf16 %v2626_v38  ;;  %2317 = vmatprep.subr.bf16.mxu1 %v2316_v36  ;;  %v2621_v42 = vpop.permute.xlu0 %2620 }
  0x84   :  { %v2623_v43 = vunpack.i.h.bf16 %v2621_v42  ;;  %v2622_v44 = vunpack.i.l.bf16 %v2621_v42  ;;  %2319 = vmatpush1.bf16.msra.mxu1 %v2318_v39 }
  0x85   :  { %v248_v45 = vsel %vm3779_vm2, %v2627_v41, %v2628_v40 }
  0x86   :  { %v2938_v46 = vpop.permute.xlu1 %2635  ;;  %v229_v47 = vsel %vm3780_vm3, %v2622_v44, %v2623_v43 }
  0x87   :  { %v2638_v48 = vunpack.i.h.bf16 %v2938_v46  ;;  %v2637_v49 = vunpack.i.l.bf16 %v2938_v46  ;;  %v2944_v50 = vpop.permute.xlu0 %2630  ;;  %v2304_v51 = vpack.c.bf16 %v248_v45, %v229_v47 }
  0x88   :  { %v2633_v52 = vunpack.i.h.bf16 %v2944_v50  ;;  %v2632_v53 = vunpack.i.l.bf16 %v2944_v50 }
  0x89   :  { %2305 = vmatprep.subr.bf16.mxu0 %v2304_v51  ;;  %v249_v54 = vsel %vm3779_vm2, %v2637_v49, %v2627_v41  ;;  %v247_v61 = vsel %vm3779_vm2, %v2628_v40, %v2638_v48 }
  0x8a   :  { %v2952_v55 = vpop.permute.xlu1 %237  ;;  %v230_v56 = vsel %vm3780_vm3, %v2632_v53, %v2622_v44  ;;  %v228_v60 = vsel %vm3780_vm3, %v2623_v43, %v2633_v52 }
  0x8b   :  { %v246_v57 = vsel %vm3779_vm2, %v2638_v48, %v2952_v55  ;;  %v2961_v58 = vpop.permute.xlu0 %218  ;;  %v2306_v59 = vpack.c.bf16 %v249_v54, %v230_v56  ;;  %v2322_v5 = vpack.c.bf16 %v247_v61, %v228_v60 }
  0x8c   :  { %v227_v62 = vsel %vm3780_vm3, %v2633_v52, %v2961_v58 }
  0x8d   :  { %v2320_v63 = vpack.c.bf16 %v246_v57, %v227_v62  ;;  %2307 = vmatpush1.bf16.msra.mxu0 %v2306_v59 }
  0x8e   :  { %v2970_v3 = vpop.permute.xlu1 %2645 }
  0x8f   :  { %v2648_v7 = vunpack.i.h.bf16 %v2970_v3  ;;  %v2647_v8 = vunpack.i.l.bf16 %v2970_v3  ;;  %v2641_v11 = vpop.permute.xlu0 %2640  ;;  %2321 = vmatprep.subr.bf16.mxu1 %v2320_v63  ;;  %v3039_v63 = vld [vmem:[%s3767_s1] sm:$0xff] }
  0x90   :  { %v2643_v13 = vunpack.i.h.bf16 %v2641_v11  ;;  %v2642_v16 = vunpack.i.l.bf16 %v2641_v11  ;;  %2323 = vmatpush1.bf16.msra.mxu1 %v2322_v5 }
  0x92   :  { %v2651_v17 = vpop.permute.xlu1 %2650  ;;  %v266_v19 = vsel %vm3778_vm4, %v2642_v16, %v2643_v13  ;;  %v267_v21 = vsel %vm3778_vm4, %v2647_v8, %v2642_v16  ;;  %v265_v26 = vsel %vm3778_vm4, %v2643_v13, %v2648_v7 }
  0x93   :  { %v2981_v22 = vpop.permute.xlu0 %258  ;;  %v2308_v23 = vpack.c.bf16 %v266_v19, %v2822_v4  ;;  %v2310_v24 = vpack.c.bf16 %v267_v21, %v2815_v2  ;;  %v2653_v29 = vunpack.i.h.bf16 %v2651_v17  ;;  %v2652_v31 = vunpack.i.l.bf16 %v2651_v17 }
  0x94   :  { %v264_v27 = vsel %vm3778_vm4, %v2648_v7, %v2981_v22  ;;  %v2326_v33 = vpack.c.bf16 %v265_v26, %v2805_v0 }
  0x95   :  { %v2324_v28 = vpack.c.bf16 %v264_v27, %v2833_v6  ;;  %2309 = vmatprep.subr.bf16.mxu0 %v2308_v23  ;;  %v285_v36 = vsel %vm3777_vm5, %v2652_v31, %v2653_v29  ;;  %v2760_v23 = vmov 1.0|1.0  }
  0x96   :  { %2311 = vmatpush1.bf16.msra.mxu0 %v2310_v24  ;;  %v2991_v32 = vpop.permute.xlu1 %2660 }
  0x97   :  { %v2656_v4 = vpop.permute.xlu0 %2655  ;;  %2325 = vmatprep.subr.bf16.mxu1 %v2324_v28  ;;  %v2662_v35 = vunpack.i.l.bf16 %v2991_v32  ;;  %v2663_v41 = vunpack.i.h.bf16 %v2991_v32 }
  0x98   :  { %v2658_v2 = vunpack.i.h.bf16 %v2656_v4  ;;  %v2657_v34 = vunpack.i.l.bf16 %v2656_v4  ;;  %2327 = vmatpush1.bf16.msra.mxu1 %v2326_v33 }
  0x99   :  { %v286_v43 = vsel %vm3777_vm5, %v2662_v35, %v2652_v31  ;;  %v284_v56 = vsel %vm3777_vm5, %v2653_v29, %v2663_v41 }
  0x9a   :  { %v2997_v6 = vpop.permute.xlu1 %277  ;;  %v304_v37 = vsel %vm3776_vm6, %v2657_v34, %v2658_v2 }
  0x9b   :  { %v3003_v0 = vpop.permute.xlu0 %2665  ;;  %v2312_v38 = vpack.c.bf16 %v304_v37, %v285_v36  ;;  %v283_v51 = vsel %vm3777_vm5, %v2663_v41, %v2997_v6 }
  0x9c   :  { %v2668_v39 = vunpack.i.h.bf16 %v3003_v0  ;;  %v2667_v40 = vunpack.i.l.bf16 %v3003_v0  ;;  %v36_v0 = vadd.s32 384, %v2898_v14 }
  0x9d   :  { %2313 = vmatprep.subr.bf16.mxu0 %v2312_v38 }
  0x9e   :  { %v310_v42 = vpop.permute.xlu1 %309  ;;  %v305_v44 = vsel %vm3776_vm6, %v2667_v40, %v2657_v34  ;;  %v303_v48 = vsel %vm3776_vm6, %v2658_v2, %v2668_v39  ;;  %v3146_v41 = vcvt.s32.f32 %v36_v0 }
  0x9f   :  { %v3016_v45 = vpop.permute.xlu0 %296  ;;  %v2314_v47 = vpack.c.bf16 %v305_v44, %v286_v43  ;;  %v2330_v59 = vpack.c.bf16 %v303_v48, %v284_v56 }
  0xa0   :  { %v302_v52 = vsel %vm3776_vm6, %v2668_v39, %v3016_v45  ;;  %v35_v39 = vadd.s32 256, %v2898_v14 }
  0xa1   :  { %v2328_v54 = vpack.c.bf16 %v302_v52, %v283_v51  ;;  %2315 = vmatpush1.bf16.msra.mxu0 %v2314_v47 }
  0xa2   :  { %v3029_v57 = vpop.permute.xlu1 %307  ;;  %v3148_v43 = vcvt.s32.f32 %v35_v39 }
  0xa3   :  { %v312_v60 = vpop.permute.xlu0 %311  ;;  %2329 = vmatprep.subr.bf16.mxu1 %v2328_v54  ;;  %v324_v61 = vsel %vm3775_vm7, %v3029_v57, %v310_v42 }
  0xa4   :  { %2331 = vmatpush1.bf16.msra.mxu1 %v2330_v59  ;;  %v323_v62 = vsel %vm3775_vm7, %v310_v42, %v312_v60  ;;  %v47_v48 = vadd.f32 0.5, %v3148_v43 }
  0xa5   :  { %346 = vmatprep.subr.mxu0 %v323_v62 }
  0xa6   :  { %347 = vmatpush1.msra.mxu0 %v324_v61  ;;  %v316_v5 = vpop.permute.xlu1 %315  ;;  %v54_v56 = vmul.f32 0.0030864198, %v47_v48 }
  0xa7   :  { %v314_v7 = vpop.permute.xlu0 %313  ;;  %1874 = vmatmul.mubr.msk.f32.vlgmr.msra.gmra.mrb[0].mxu0 %vm3774_vm8, %v3039_v63 }
  0xa8   :  { %v321_v11 = vsel %vm3775_vm7, %v314_v7, %v316_v5  ;;  %v322_v13 = vsel %vm3775_vm7, %v312_v60, %v314_v7  ;;  %536 = vmatprep.mubr.f32.mxu0 %v2758_v10  ;;  %v60_v61 = vfloor.f32 %v54_v56 }
  0xa9   :  { %417 = vmatprep.subr.mxu1 %v321_v11  ;;  %v38_v11 = vadd.s32 640, %v2898_v14 }
  0xaa   :  { %418 = vmatpush1.msra.mxu1 %v322_v13  ;;  %v202_v16 = vpop.permute.xlu1 %201  ;;  %v66_v7 = vmul.f32 324.0, %v60_v61 }
  0xab   :  { %v206_v17 = vsel %vm3781_vm1, %v202_v16, %v2617_v20  ;;  %v207_v19 = vsel %vm3781_vm1, %v2908_v25, %v202_v16  ;;  %v183_v21 = vpop.permute.xlu0 %182  ;;  %1875 = vmatmul.mubr.msk.f32.vlgmr.msra.gmra.mrb[0].mxu1 %vm3774_vm8, %v3039_v63  ;;  %2348 = vmatprep.subr.bf16.mxu1 %v2760_v23 }
  0xac   :  { %v187_v24 = vsel %vm3782_vm0, %v183_v21, %v2612_v15  ;;  %v188_v18 = vsel %vm3782_vm0, %v2922_v30, %v183_v21  ;;  %2349 = vmatpush3.bf16.msra.mxu1 %v2760_v23  ;;  %v3155_v21 = vcvt.s32.f32 %v38_v11 }
  0xad   :  { %v2332_v20 = vpack.c.bf16 %v206_v17, %v187_v24  ;;  %v2334_v25 = vpack.c.bf16 %v207_v19, %v188_v18  ;;  %2350 = vmatprep.subr.bf16.mxu1 %v2760_v23  ;;  %v72_v19 = vsub.f32 %v3148_v43, %v66_v7  ;;  %v37_v24 = vadd.s32 512, %v2898_v14 }
  0xae   :  { %v240_v26 = vpop.permute.xlu1 %239 }
  0xaf   :  { %v244_v27 = vsel %vm3779_vm2, %v240_v26, %v2637_v49  ;;  %v245_v12 = vsel %vm3779_vm2, %v2952_v55, %v240_v26  ;;  %v221_v15 = vpop.permute.xlu0 %220  ;;  %2333 = vmatprep.subr.bf16.mxu0 %v2332_v20  ;;  %v78_v26 = vadd.f32 0.5, %v72_v19 }
  0xb0   :  { %v225_v30 = vsel %vm3780_vm3, %v221_v15, %v2632_v53  ;;  %v226_v28 = vsel %vm3780_vm3, %v2961_v58, %v221_v15  ;;  %2335 = vmatpush1.bf16.msra.mxu0 %v2334_v25  ;;  %2351 = vmatpush3.bf16.msra.mxu1 %v2760_v23 }
  0xb1   :  { %v2336_v46 = vpack.c.bf16 %v244_v27, %v225_v30  ;;  %v2338_v49 = vpack.c.bf16 %v245_v12, %v226_v28  ;;  %2352 = vmatprep.subr.bf16.mxu1 %v2760_v23  ;;  %v50_v27 = vadd.f32 0.5, %v3155_v21  ;;  %v3159_v12 = vcvt.s32.f32 %v37_v24 }
  0xb2   :  { %v280_v29 = vpop.permute.xlu1 %279 }
  0xb3   :  { %v261_v55 = vpop.permute.xlu0 %260  ;;  %2337 = vmatprep.subr.bf16.mxu0 %v2336_v46  ;;  %v282_v33 = vsel %vm3777_vm5, %v2997_v6, %v280_v29  ;;  %v287_v3 = vsel %vm3777_vm5, %v280_v29, %v2662_v35  ;;  %v39_v35 = vcvt.s32.f32 %v2898_v14  ;;  %v34_v6 = vadd.s32 128, %v2898_v14 }
  0xb4   :  { %v263_v50 = vsel %vm3778_vm4, %v2981_v22, %v261_v55  ;;  %v268_v53 = vsel %vm3778_vm4, %v261_v55, %v2647_v8  ;;  %2339 = vmatpush1.bf16.msra.mxu0 %v2338_v49  ;;  %2353 = vmatpush3.bf16.msra.mxu1 %v2760_v23  ;;  %v85_v46 = vmul.f32 0.055555556, %v78_v26  ;;  %v57_v49 = vmul.f32 0.0030864198, %v50_v27 }
  0xb5   :  { %v2340_v58 = vpack.c.bf16 %v268_v53, %v2810_v1  ;;  %v2342_v31 = vpack.c.bf16 %v263_v50, %v2856_v9  ;;  %2354 = vmatprep.subr.bf16.mxu1 %v2760_v23  ;;  %v45_v36 = vadd.f32 0.5, %v39_v35  ;;  %v40_v37 = vcvt.s32.f32 %v34_v6 }
  0xb6   :  { %v318_v9 = vpop.permute.xlu1 %317  ;;  %vm107_vm9 = vcmp.lt.f32.partialorder %v39_v35, 648.0  ;;  %v49_v29 = vadd.f32 0.5, %v3159_v12  ;;  %v91_v53 = vfloor.f32 %v85_v46 }
  0xb7   :  { %v299_v4 = vpop.permute.xlu0 %298  ;;  %2341 = vmatprep.subr.bf16.mxu0 %v2340_v58  ;;  %v325_v32 = vsel %vm3775_vm7, %v318_v9, %v3029_v57  ;;  %v320_v34 = vsel %vm3775_vm7, %v316_v5, %v318_v9  ;;  %v52_v38 = vmul.f32 0.0030864198, %v45_v36  ;;  %vm108_vm15 = vcmp.lt.f32.partialorder %v40_v37, 648.0 }
  0xb8   :  { %v301_v8 = vsel %vm3776_vm6, %v3016_v45, %v299_v4  ;;  %v306_v1 = vsel %vm3776_vm6, %v299_v4, %v2667_v40  ;;  %2343 = vmatpush1.bf16.msra.mxu0 %v2342_v31  ;;  %2355 = vmatpush3.bf16.msra.mxu1 %v2760_v23  ;;  %v46_v40 = vadd.f32 0.5, %v40_v37  ;;  %v48_v45 = vadd.f32 0.5, %v3146_v41 }
  0xb9   :  { %v2344_v22 = vpack.c.bf16 %v306_v1, %v287_v3  ;;  %v2346_v2 = vpack.c.bf16 %v301_v8, %v282_v33  ;;  %2356 = vmatprep.subr.bf16.mxu1 %v2760_v23  ;;  %v58_v42 = vfloor.f32 %v52_v38  ;;  %v63_v58 = vfloor.f32 %v57_v49 }
  0xba   :  { %v53_v44 = vmul.f32 0.0030864198, %v46_v40  ;;  %v55_v52 = vmul.f32 0.0030864198, %v48_v45  ;;  %v56_v31 = vmul.f32 0.0030864198, %v49_v29 }
  0xbb   :  { %2345 = vmatprep.subr.bf16.mxu0 %v2344_v22  ;;  %v64_v47 = vmul.f32 324.0, %v58_v42  ;;  %v97_v3 = vmul.f32 18.0, %v91_v53  ;;  %v69_v8 = vmul.f32 324.0, %v63_v58  ;;  %v3783_v1 = vmov 0 }
  0xbc   :  { %2347 = vmatpush1.bf16.msra.mxu0 %v2346_v2  ;;  %2357 = vmatpush3.bf16.msra.mxu1 %v2760_v23  ;;  %v59_v51 = vfloor.f32 %v53_v44  ;;  %v61_v59 = vfloor.f32 %v55_v52  ;;  %v62_v9 = vfloor.f32 %v56_v31  ;;  %vm127_vm1 = vcmp.le.f32.partialorder %v91_v53, 16.0 }
  0xbd   :  { %488 = vmatprep.subr.mxu0 %v325_v32  ;;  %2358 = vmatprep.subr.bf16.mxu1 %v2760_v23  ;;  %v70_v54 = vsub.f32 %v39_v35, %v64_v47  ;;  %v103_v2 = vsub.f32 %v72_v19, %v97_v3  ;;  %v75_v32 = vsub.f32 %v3155_v21, %v69_v8 }
  0xbe   :  { %v65_v57 = vmul.f32 324.0, %v59_v51 }
  0xbf   :  { %v76_v60 = vadd.f32 0.5, %v70_v54  ;;  %v81_v35 = vadd.f32 0.5, %v75_v32 }
  0xc0   :  { %489 = vmatpush1.msra.mxu0 %v320_v34  ;;  %2359 = vmatpush3.bf16.msra.mxu1 %v2760_v23  ;;  %v71_v62 = vsub.f32 %v40_v37, %v65_v57  ;;  %v68_v34 = vmul.f32 324.0, %v62_v9 }
  0xc1   :  { %1876 = vmatmul.mubr.msk.f32.vlgmr.msra.gmra.mrb[2].mxu0 %vm3774_vm8, %v3039_v63  ;;  %2364 = vmatprep.subr.bf16.mxu0 %v2760_v23  ;;  %v67_v63 = vmul.f32 324.0, %v61_v59  ;;  %v83_v5 = vmul.f32 0.055555556, %v76_v60  ;;  %v88_v38 = vmul.f32 0.055555556, %v81_v35 }
  0xc2   :  { %2365 = vmatpush3.bf16.msra.mxu0 %v2760_v23  ;;  %2360 = vmatprep.subr.bf16.mxu1 %v2760_v23  ;;  %v77_v13 = vadd.f32 0.5, %v71_v62  ;;  %v74_v6 = vsub.f32 %v3159_v12, %v68_v34 }
  0xc3   :  { %2366 = vmatprep.subr.bf16.mxu0 %v2760_v23  ;;  %v73_v16 = vsub.f32 %v3146_v41, %v67_v63  ;;  %v89_v17 = vfloor.f32 %v83_v5  ;;  %v94_v47 = vfloor.f32 %v88_v38 }
  0xc4   :  { %2361 = vmatpush3.bf16.msra.mxu1 %v2760_v23  ;;  %v84_v18 = vmul.f32 0.055555556, %v77_v13 }
  0xc5   :  { %2362 = vmatprep.subr.bf16.mxu1 %v2760_v23  ;;  %v79_v20 = vadd.f32 0.5, %v73_v16  ;;  %v95_v25 = vmul.f32 18.0, %v89_v17  ;;  %vm113_vm10 = vcmp.ge.f32.partialorder %v89_v17, 1.0  ;;  %vm125_vm12 = vcmp.le.f32.partialorder %v89_v17, 16.0 }
  0xc6   :  { %2367 = vmatpush3.bf16.msra.mxu0 %v2760_v23  ;;  %v90_v15 = vfloor.f32 %v84_v18  ;;  %vm119_vm11 = vmand %vm107_vm9, %vm113_vm10  ;;  %vm110_vm9 = vcmp.lt.f32.partialorder %v3146_v41, 648.0  ;;  %v80_v41 = vadd.f32 0.5, %v74_v6  ;;  %v100_v56 = vmul.f32 18.0, %v94_v47 }
  0xc7   :  { %2368 = vmatprep.subr.bf16.mxu0 %v2760_v23  ;;  %v86_v30 = vmul.f32 0.055555556, %v79_v20  ;;  %v101_v28 = vsub.f32 %v70_v54, %v95_v25  ;;  %vm131_vm13 = vmand %vm119_vm11, %vm125_vm12  ;;  %vm109_vm11 = vcmp.lt.f32.partialorder %v3148_v43, 648.0  ;;  %vm115_vm12 = vcmp.ge.f32.partialorder %v91_v53, 1.0 }
  0xc8   :  { %2363 = vmatpush3.bf16.msra.mxu1 %v2760_v23  ;;  %v96_v55 = vmul.f32 18.0, %v90_v15  ;;  %vm114_vm8 = vcmp.ge.f32.partialorder %v90_v15, 1.0  ;;  %vm126_vm4 = vcmp.le.f32.partialorder %v90_v15, 16.0  ;;  %v87_v51 = vmul.f32 0.055555556, %v80_v41  ;;  %v983_v41 = vld [vmem:[%s3769_s4] sm:$0xff] }
  0xc9   :  { %2380 = vmatprep.subr.bf16.mxu1 %v2760_v23  ;;  %v92_v50 = vfloor.f32 %v86_v30  ;;  %vm137_vm14 = vcmp.ge.f32.partialorder %v101_v28, 1.0  ;;  %vm149_vm6 = vcmp.le.f32.partialorder %v101_v28, 16.0  ;;  %vm120_vm5 = vmand %vm108_vm15, %vm114_vm8  ;;  %v106_v60 = vsub.f32 %v75_v32, %v100_v56 }
  0xca   :  { %2369 = vmatpush3.bf16.msra.mxu0 %v2760_v23  ;;  %vm143_vm7 = vmand %vm131_vm13, %vm137_vm14  ;;  %v102_v33 = vsub.f32 %v71_v62, %v96_v55  ;;  %v93_v59 = vfloor.f32 %v87_v51  ;;  %v2761_v20 = vmov 0  }
  0xcb   :  { %2370 = vmatprep.subr.bf16.mxu0 %v2760_v23  ;;  %v98_v4 = vmul.f32 18.0, %v92_v50  ;;  %vm116_vm10 = vcmp.ge.f32.partialorder %v92_v50, 1.0  ;;  %vm3163_vm2 = vmand %vm143_vm7, %vm149_vm6  ;;  %vm128_vm8 = vcmp.le.f32.partialorder %v92_v50, 16.0  ;;  %2669 = vset.pattern.permute.xlu0 %v2761_v20 }
  0xcc   :  { %v3784_v1 = vsel %vm3163_vm2, 4294967295, %v3783_v1  ;;  %vm132_vm3 = vmand %vm120_vm5, %vm126_vm4  ;;  %vm138_vm13 = vcmp.ge.f32.partialorder %v102_v33, 1.0  ;;  %vm150_vm6 = vcmp.le.f32.partialorder %v102_v33, 16.0  ;;  %vm139_vm5 = vcmp.ge.f32.partialorder %v103_v2, 1.0  ;;  %2670 = vset.pattern.permute.xlu1 %v2761_v20 }
  0xcd   :  { %v104_v22 = vsub.f32 %v73_v16, %v98_v4  ;;  %vm122_vm14 = vmand %vm110_vm9, %vm116_vm10  ;;  %v99_v61 = vmul.f32 18.0, %v93_v59 }
  0xce   :  { %2371 = vmatpush3.bf16.msra.mxu0 %v2760_v23  ;;  %vm121_vm15 = vmand %vm109_vm11, %vm115_vm12  ;;  %vm3785_vm12 = vnez %v3784_v1 }
  0xcf   :  { %2372 = vmatprep.subr.bf16.mxu0 %v2760_v23  ;;  %vm144_vm0 = vmand %vm132_vm3, %vm138_vm13  ;;  %vm140_vm2 = vcmp.ge.f32.partialorder %v104_v22, 1.0  ;;  %vm152_vm11 = vcmp.le.f32.partialorder %v104_v22, 16.0  ;;  %v3173_v36 = vsel %vm3785_vm12, 1.0, %v2758_v10  ;;  %vm151_vm13 = vcmp.le.f32.partialorder %v103_v2, 16.0 }
  0xd0   :  { %vm134_vm7 = vmand %vm122_vm14, %vm128_vm8  ;;  %v105_v62 = vsub.f32 %v74_v6, %v99_v61  ;;  %vm154_vm12 = vcmp.le.f32.partialorder %v106_v60, 16.0 }
  0xd1   :  { %vm133_vm4 = vmand %vm121_vm15, %vm127_vm1  ;;  %vm112_vm1 = vcmp.lt.f32.partialorder %v3155_v21, 648.0  ;;  %vm130_vm15 = vcmp.le.f32.partialorder %v94_v47, 16.0 }
  0xd2   :  { %2373 = vmatpush3.bf16.msra.mxu0 %v2760_v23  ;;  %vm156_vm9 = vmand %vm144_vm0, %vm150_vm6  ;;  %vm111_vm6 = vcmp.lt.f32.partialorder %v3159_v12, 648.0 }
  0xd3   :  { %2374 = vmatprep.subr.bf16.mxu0 %v2760_v23  ;;  %vm146_vm10 = vmand %vm134_vm7, %vm140_vm2  ;;  %v3176_v37 = vsel %vm156_vm9, 1.0, %v2758_v10  ;;  %vm118_vm2 = vcmp.ge.f32.partialorder %v94_v47, 1.0  ;;  %vm117_vm7 = vcmp.ge.f32.partialorder %v93_v59, 1.0 }
  0xd4   :  { %vm145_vm3 = vmand %vm133_vm4, %vm139_vm5  ;;  %vm142_vm5 = vcmp.ge.f32.partialorder %v106_v60, 1.0 }
  0xd5   :  { %vm158_vm14 = vmand %vm146_vm10, %vm152_vm11  ;;  %vm129_vm10 = vcmp.le.f32.partialorder %v93_v59, 16.0 }
  0xd6   :  { %2375 = vmatpush3.bf16.msra.mxu0 %v2760_v23  ;;  %vm157_vm0 = vmand %vm145_vm3, %vm151_vm13  ;;  %v3185_v43 = vsel %vm158_vm14, 1.0, %v2758_v10  ;;  %vm141_vm13 = vcmp.ge.f32.partialorder %v105_v62, 1.0 }
  0xd7   :  { %2376 = vmatprep.subr.bf16.mxu0 %v2760_v23  ;;  %v3188_v44 = vsel %vm157_vm0, 1.0, %v2758_v10  ;;  %vm124_vm8 = vmand %vm112_vm1, %vm118_vm2  ;;  %vm153_vm1 = vcmp.le.f32.partialorder %v105_v62, 16.0 }
  0xd8   :  { %vm136_vm4 = vmand %vm124_vm8, %vm130_vm15  ;;  %vm3786_vm8 = vcmp.lt.s32.totalorder %v2898_v14, 19  ;;  %vm3787_vm15 = vcmp.lt.s32.totalorder %v2898_v14, 18 }
  0xd9   :  { %vm123_vm9 = vmand %vm111_vm6, %vm117_vm7 }
  0xda   :  { %2377 = vmatpush3.bf16.msra.mxu0 %v2760_v23  ;;  %vm148_vm11 = vmand %vm136_vm4, %vm142_vm5 }
  0xdb   :  { %2378 = vmatprep.subr.bf16.mxu0 %v2760_v23  ;;  %vm135_vm3 = vmand %vm123_vm9, %vm129_vm10 }
  0xdc   :  { %vm160_vm14 = vmand %vm148_vm11, %vm154_vm12  ;;  %vm3794_vm11 = vcmp.lt.s32.totalorder %v2898_v14, 17  ;;  %vm3795_vm12 = vcmp.lt.s32.totalorder %v2898_v14, 1 }
  0xdd   :  { %vm147_vm0 = vmand %vm135_vm3, %vm141_vm13  ;;  %v3223_v63 = vsel %vm160_vm14, 1.0, %v2758_v10 }
  0xde   :  { %2379 = vmatpush3.bf16.msra.mxu0 %v2760_v23  ;;  %vm159_vm2 = vmand %vm147_vm0, %vm153_vm1 }
  0xdf   :  { %2396 = vmatprep.subr.bf16.mxu0 %v2760_v23  ;;  %v3235_v13 = vsel %vm159_vm2, 1.0, %v2758_v10  ;;  %vm3788_vm6 = vmmov %vm3787_vm15 }
  0xe0   :  { %vm3789_vm7 = vmmov %vm3786_vm8 }
  0xe1   :  { %vm3790_vm4 = vmmov %vm3788_vm6 }
  0xe2   :  { %vm3791_vm5 = vmmov %vm3789_vm7 }
  0xe3   :  { %vm3792_vm9 = vmmov %vm3790_vm4 }
  0xe4   :  { %vm3793_vm10 = vmmov %vm3791_vm5 }
  0xe5   :  { %vm3796_vm3 = vmmov %vm3795_vm12 }
  0xe6   :  { %vm3797_vm13 = vmmov %vm3794_vm11 }
  0xe7   :  { %vm3798_vm14 = vmmov %vm3796_vm3 }
  0xe8   :  { %vm3799_vm0 = vmmov %vm3794_vm11 }
  0xe9   :  { %vm3800_vm1 = vmmov %vm3796_vm3 }
  0xea   :  { %vm3801_vm2 = vmmov %vm3799_vm0 }
 0x17a   :  { %v396_v0 = vpop.f32.mrb[0].mxu0 }
 0x17b   :  { %v3179_v39 = vmul.f32 %v3173_v36, %v396_v0  ;;  %v398_v40 = vpop.f32.mrb[1].mxu0  ;;  %v979_v0 = vld [vmem:[%s3768_s3] sm:$0xff] }
 0x17c   :  { %v3182_v42 = vmul.f32 %v3176_v37, %v398_v40 }
 0x17d   :  { %v759_v19 = vmul.f32 %v3179_v39, %v3179_v39 }
 0x17e   :  { %v467_v45 = vpop.f32.mrb[0].mxu1  ;;  %613 = vmatprep.mubr.f32.mxu1 %v3182_v42  ;;  %v760_v57 = vmul.f32 %v3182_v42, %v3182_v42 }
 0x17f   :  { %v469_v48 = vpop.f32.mrb[1].mxu1  ;;  %614 = vmatmul.mubr.f32.vlgmr.msra.gmra.mrb[2].mxu1 %v3179_v39  ;;  %v3197_v54 = vmul.f32 %v3188_v44, %v467_v45 }
 0x180   :  { %v3193_v52 = vmul.f32 %v3185_v43, %v469_v48  ;;  %2381 = vmatpush3.bf16.msra.mxu1 %v2760_v23 }
 0x181   :  { %2382 = vmatprep.subr.bf16.mxu1 %v2760_v23  ;;  %v761_v24 = vmul.f32 %v3197_v54, %v3197_v54 }
 0x182   :  { %683 = vmatprep.mubr.f32.mxu0 %v3193_v52  ;;  %v762_v17 = vmul.f32 %v3193_v52, %v3193_v52 }
 0x183   :  { %684 = vmatmul.mubr.f32.vlgmr.msra.gmra.mrb[4].mxu0 %v3197_v54 }
 0x184   :  { %2383 = vmatpush3.bf16.msra.mxu1 %v2760_v23  ;;  %2397 = vmatpush3.bf16.msra.mxu0 %v2760_v23 }
 0x185   :  { %829 = vmatprep.mubr.f32.mxu0 %v760_v57  ;;  %2384 = vmatprep.subr.bf16.mxu1 %v2760_v23 }
 0x186   :  { %2398 = vmatprep.subr.bf16.mxu0 %v2760_v23 }
 0x188   :  { %2385 = vmatpush3.bf16.msra.mxu1 %v2760_v23  ;;  %2399 = vmatpush3.bf16.msra.mxu0 %v2760_v23 }
 0x189   :  { %2386 = vmatprep.subr.bf16.mxu1 %v2760_v23  ;;  %2400 = vmatprep.subr.bf16.mxu0 %v2760_v23 }
 0x18c   :  { %2387 = vmatpush3.bf16.msra.mxu1 %v2760_v23  ;;  %2401 = vmatpush3.bf16.msra.mxu0 %v2760_v23 }
 0x18d   :  { %2388 = vmatprep.subr.bf16.mxu1 %v2760_v23  ;;  %2402 = vmatprep.subr.bf16.mxu0 %v2760_v23 }
 0x190   :  { %2389 = vmatpush3.bf16.msra.mxu1 %v2760_v23  ;;  %2403 = vmatpush3.bf16.msra.mxu0 %v2760_v23 }
 0x191   :  { %2390 = vmatprep.subr.bf16.mxu1 %v2760_v23  ;;  %2404 = vmatprep.subr.bf16.mxu0 %v2760_v23 }
 0x194   :  { %2391 = vmatpush3.bf16.msra.mxu1 %v2760_v23  ;;  %2405 = vmatpush3.bf16.msra.mxu0 %v2760_v23  ;;  %v538_v5 = vpop.f32.mrb[2].mxu0 }
 0x195   :  { %2392 = vmatprep.subr.bf16.mxu1 %v2760_v23  ;;  %2406 = vmatprep.subr.bf16.mxu0 %v2760_v23  ;;  %v540_v7 = vpop.f32.mrb[3].mxu0  ;;  %v3241_v16 = vmul.f32 %v3235_v13, %v538_v5 }
 0x196   :  { %v3230_v11 = vmul.f32 %v3223_v63, %v540_v7 }
 0x197   :  { %v763_v18 = vmul.f32 %v3241_v16, %v3241_v16 }
 0x198   :  { %2393 = vmatpush3.bf16.msra.mxu1 %v2760_v23  ;;  %2407 = vmatpush3.bf16.msra.mxu0 %v2760_v23  ;;  %v764_v21 = vmul.f32 %v3230_v11, %v3230_v11 }
 0x199   :  { %2394 = vmatprep.subr.bf16.mxu1 %v2760_v23  ;;  %2408 = vmatprep.subr.bf16.mxu0 %v2760_v23 }
 0x19a   :  { %753 = vmatprep.mubr.f32.mxu1 %v3230_v11 }
 0x19c   :  { %2395 = vmatpush3.bf16.msra.mxu1 %v2760_v23  ;;  %2409 = vmatpush3.bf16.msra.mxu0 %v2760_v23 }
 0x19d   :  { %2410 = vmatprep.subr.bf16.mxu0 %v2760_v23  ;;  %2412 = vmatprep.subr.bf16.mxu1 %v2760_v23 }
 0x19f   :  { %754 = vmatmul.mubr.f32.vlgmr.msra.gmra.mrb[4].mxu1 %v3241_v16 }
 0x1a0   :  { %2411 = vmatpush3.bf16.msra.mxu0 %v2760_v23  ;;  %2413 = vmatpush3.bf16.msra.mxu1 %v2760_v23 }
 0x1a1   :  { %899 = vmatprep.mubr.f32.mxu1 %v762_v17  ;;  %2414 = vmatprep.subr.bf16.mxu1 %v2760_v23 }
 0x1a2   :  { %2428 = vmatprep.subr.bf16.mxu0 %v2760_v23 }
 0x1a3   :  { %830 = vmatmul.mubr.f32.vlgmr.msra.gmra.mrb[6].mxu0 %v759_v19 }
 0x1a4   :  { %2415 = vmatpush3.bf16.msra.mxu1 %v2760_v23  ;;  %2429 = vmatpush3.bf16.msra.mxu0 %v2760_v23 }
 0x1a5   :  { %969 = vmatprep.mubr.f32.mxu0 %v764_v21  ;;  %2416 = vmatprep.subr.bf16.mxu1 %v2760_v23 }
 0x1a6   :  { %2430 = vmatprep.subr.bf16.mxu0 %v2760_v23 }
 0x1a8   :  { %2417 = vmatpush3.bf16.msra.mxu1 %v2760_v23  ;;  %2431 = vmatpush3.bf16.msra.mxu0 %v2760_v23 }
 0x1a9   :  { %2418 = vmatprep.subr.bf16.mxu1 %v2760_v23  ;;  %2432 = vmatprep.subr.bf16.mxu0 %v2760_v23 }
 0x1ac   :  { %2419 = vmatpush3.bf16.msra.mxu1 %v2760_v23  ;;  %2433 = vmatpush3.bf16.msra.mxu0 %v2760_v23 }
 0x1ad   :  { %2420 = vmatprep.subr.bf16.mxu1 %v2760_v23  ;;  %2434 = vmatprep.subr.bf16.mxu0 %v2760_v23 }
 0x1b0   :  { %2421 = vmatpush3.bf16.msra.mxu1 %v2760_v23  ;;  %2435 = vmatpush3.bf16.msra.mxu0 %v2760_v23 }
 0x1b1   :  { %2422 = vmatprep.subr.bf16.mxu1 %v2760_v23  ;;  %2436 = vmatprep.subr.bf16.mxu0 %v2760_v23 }
 0x1b4   :  { %2423 = vmatpush3.bf16.msra.mxu1 %v2760_v23  ;;  %2437 = vmatpush3.bf16.msra.mxu0 %v2760_v23 }
 0x1b5   :  { %2424 = vmatprep.subr.bf16.mxu1 %v2760_v23  ;;  %2438 = vmatprep.subr.bf16.mxu0 %v2760_v23 }
 0x1b8   :  { %2425 = vmatpush3.bf16.msra.mxu1 %v2760_v23  ;;  %2439 = vmatpush3.bf16.msra.mxu0 %v2760_v23 }
 0x1b9   :  { %2426 = vmatprep.subr.bf16.mxu1 %v2760_v23  ;;  %2440 = vmatprep.subr.bf16.mxu0 %v2760_v23 }
 0x1bc   :  { %2427 = vmatpush3.bf16.msra.mxu1 %v2760_v23  ;;  %2441 = vmatpush3.bf16.msra.mxu0 %v2760_v23 }
 0x1bd   :  { %2442 = vmatprep.subr.bf16.mxu0 %v2760_v23 }
 0x1bf   :  { %900 = vmatmul.mubr.f32.vlgmr.msra.gmra.mrb[6].mxu1 %v761_v24 }
 0x1c0   :  { %2443 = vmatpush3.bf16.msra.mxu0 %v2760_v23  ;;  %1232 = vmatprep.mubr.f32.mxu1 %v2758_v10 }
 0x1c3   :  { %970 = vmatmul.mubr.f32.vlgmr.msra.gmra.mrb[8].mxu0 %v763_v18 }
 0x1c4   :  { %1303 = vmatprep.mubr.f32.mxu0 %v2758_v10 }
 0x252   :  { %v1912_v25 = vpop.f32.mrb[2].mxu1 }
 0x253   :  { %v1913_v26 = vpop.f32.mrb[3].mxu1 }
 0x254   :  { %v1914_v27 = vadd.f32 %v1913_v26, %v1912_v25 }
 0x256   :  { %v1947_v12 = vpop.f32.mrb[4].mxu0 }
 0x257   :  { %v1948_v15 = vpop.f32.mrb[5].mxu0 }
 0x258   :  { %v1949_v30 = vadd.f32 %v1948_v15, %v1947_v12 }
 0x25a   :  { %v686_v28 = vadd.f32 %v1949_v30, %v1914_v27 }
 0x272   :  { %v1982_v46 = vpop.f32.mrb[4].mxu1 }
 0x273   :  { %v1983_v49 = vpop.f32.mrb[5].mxu1 }
 0x274   :  { %v1984_v29 = vadd.f32 %v1983_v49, %v1982_v46 }
 0x276   :  { %v756_v55 = vadd.f32 %v1984_v29, %v686_v28  ;;  %v2017_v50 = vpop.f32.mrb[6].mxu0 }
 0x277   :  { %v2018_v53 = vpop.f32.mrb[7].mxu0 }
 0x278   :  { %v2019_v58 = vadd.f32 %v2018_v53, %v2017_v50  ;;  %v975_v9 = vmul.f32 0.001953125, %v756_v55 }
 0x27a   :  { %v977_v32 = vmul.f32 %v975_v9, %v975_v9 }
 0x292   :  { %v2052_v31 = vpop.f32.mrb[6].mxu1 }
 0x293   :  { %v2053_v33 = vpop.f32.mrb[7].mxu1 }
 0x294   :  { %v2054_v4 = vadd.f32 %v2053_v33, %v2052_v31 }
 0x296   :  { %v902_v3 = vadd.f32 %v2054_v4, %v2019_v58  ;;  %v2087_v8 = vpop.f32.mrb[8].mxu0 }
 0x297   :  { %v2088_v1 = vpop.f32.mrb[9].mxu0 }
 0x298   :  { %v2089_v22 = vadd.f32 %v2088_v1, %v2087_v8 }
 0x29a   :  { %v972_v2 = vadd.f32 %v2089_v22, %v902_v3 }
 0x29c   :  { %v976_v34 = vmul.f32 0.001953125, %v972_v2 }
 0x29e   :  { %v978_v35 = vsub.f32 %v976_v34, %v977_v32 }
 0x2a0   :  { %v980_v6 = vadd.f32 1e-05, %v978_v35 }
 0x2a2   :  { %2741 = vrsqrt.f32 %v980_v6 }
 0x2ac   :  { %v2742_v38 = vpop.eup %2741 }
 0x2ad   :  { %v982_v40 = vmul.f32 %v2742_v38, %v979_v0 }
 0x2af   :  { %988 = vperm.xlu0 %2669, %v982_v40   ;;  %v984_v45 = vmul.f32 %v982_v40, %v975_v9 }
 0x2b1   :  { %v985_v47 = vsub.f32 %v983_v41, %v984_v45 }
 0x2b3   :  { %999 = vperm.xlu1 %2670, %v985_v47  }
 0x32e   :  { %v989_v48 = vpop.permute.xlu0 %988 }
 0x32f   :  { %v991_v51 = vmul.f32 %v989_v48, %v3179_v39  ;;  %v992_v56 = vmul.f32 %v989_v48, %v3182_v42  ;;  %v993_v57 = vmul.f32 %v989_v48, %v3197_v54  ;;  %v996_v59 = vmul.f32 %v989_v48, %v3230_v11 }
 0x330   :  { %v994_v24 = vmul.f32 %v989_v48, %v3193_v52  ;;  %v995_v12 = vmul.f32 %v989_v48, %v3241_v16 }
 0x332   :  { %v1000_v60 = vpop.permute.xlu1 %999 }
 0x333   :  { %v1002_v61 = vadd.f32 %v1000_v60, %v991_v51  ;;  %v1003_v62 = vadd.f32 %v1000_v60, %v992_v56  ;;  %v1004_v5 = vadd.f32 %v1000_v60, %v993_v57  ;;  %v1007_v7 = vadd.f32 %v1000_v60, %v996_v59 }
 0x334   :  { %v1005_v42 = vadd.f32 %v1000_v60, %v994_v24  ;;  %v1006_v15 = vadd.f32 %v1000_v60, %v995_v12 }
 0x335   :  { %v1008_v17 = vmax.f32 %v1002_v61, 0.0  ;;  %v1009_v19 = vmax.f32 %v1003_v62, 0.0  ;;  %v1010_v21 = vmax.f32 %v1004_v5, 0.0  ;;  %v1013_v18 = vmax.f32 %v1007_v7, 0.0 }
 0x336   :  { %v1011_v52 = vmax.f32 %v1005_v42, 0.0  ;;  %v1012_v30 = vmax.f32 %v1006_v15, 0.0 }
 0x337   :  { %v3304_v20 = vmul.f32 %v3173_v36, %v1008_v17  ;;  %v3307_v39 = vmul.f32 %v3176_v37, %v1009_v19  ;;  %v3310_v54 = vmul.f32 %v3188_v44, %v1010_v21  ;;  %v3313_v11 = vmul.f32 %v3223_v63, %v1013_v18 }
 0x338   :  { %v3324_v27 = vmul.f32 %v3185_v43, %v1011_v52  ;;  %v3346_v16 = vmul.f32 %v3235_v13, %v1012_v30 }
 0x339   :  { %v2676_v25 = vpack.i.bf16 %v3307_v39, %v3304_v20  ;;  %v2686_v26 = vpack.i.bf16 %v3310_v54, %v3313_v11  ;;  %v2711_v46 = vpack.i.bf16 %v3310_v54, %v3307_v39 }
 0x33a   :  { %v2716_v28 = vpack.i.bf16 %v3324_v27, %v3304_v20 }
 0x33b   :  { %2677 = vrot.lane.b32.xlu0 %v2676_v25, %s2752_s10  ;;  %2672 = vrot.lane.b32.xlu1 %v2676_v25, %s2751_s9 }
 0x33f   :  { %2687 = vrot.lane.b32.xlu0 %v2686_v26, %s2752_s10  ;;  %2682 = vrot.lane.b32.xlu1 %v2686_v26, %s2751_s9 }
 0x343   :  { %1045 = vrot.lane.b32.xlu0 %v3324_v27, %s2752_s10  ;;  %1027 = vrot.lane.b32.xlu1 %v3324_v27, %s2751_s9 }
 0x347   :  { %2697 = vrot.lane.b32.xlu0 %v2676_v25, %s2753_s13  ;;  %2692 = vrot.lane.b32.xlu1 %v2676_v25, %s2754_s14 }
 0x34b   :  { %2707 = vrot.lane.b32.xlu0 %v2686_v26, %s2753_s13  ;;  %2702 = vrot.lane.b32.xlu1 %v2686_v26, %s2754_s14 }
 0x34f   :  { %1081 = vrot.lane.b32.xlu0 %v3324_v27, %s2753_s13  ;;  %1063 = vrot.lane.b32.xlu1 %v3324_v27, %s2754_s14 }
 0x353   :  { %2717 = vrot.lane.b32.xlu0 %v2716_v28, %s2755_s15  ;;  %2712 = vrot.lane.b32.xlu1 %v2711_v46, %s2755_s15 }
 0x357   :  { %2722 = vrot.lane.b32.xlu0 %v2711_v46, %s2756_s18  ;;  %1101 = vrot.lane.b32.xlu1 %v3346_v16, %s2755_s15 }
 0x35b   :  { %2732 = vrot.lane.b32.xlu0 %v2716_v28, %s2756_s18  ;;  %2727 = vrot.lane.b32.xlu1 %v2711_v46, %s2757_s19 }
 0x35f   :  { %1119 = vrot.lane.b32.xlu0 %v3346_v16, %s2756_s18  ;;  %2737 = vrot.lane.b32.xlu1 %v2716_v28, %s2757_s19 }
 0x363   :  { %1149 = vrot.lane.b32.xlu0 %v3307_v39, %s2759_s20  ;;  %1137 = vrot.lane.b32.xlu1 %v3346_v16, %s2757_s19 }
 0x367   :  { %1147 = vrot.lane.b32.xlu0 %v3304_v20, %s2759_s20  ;;  %1151 = vrot.lane.b32.xlu1 %v3310_v54, %s2759_s20 }
 0x36b   :  { %1155 = vrot.lane.b32.xlu0 %v3346_v16, %s2759_s20  ;;  %1153 = vrot.lane.b32.xlu1 %v3324_v27, %s2759_s20 }
 0x36f   :  { %1047 = vrot.lane.b32.xlu0 %v3346_v16, %s2752_s10  ;;  %1029 = vrot.lane.b32.xlu1 %v3346_v16, %s2751_s9 }
 0x373   :  { %1083 = vrot.lane.b32.xlu0 %v3346_v16, %s2753_s13  ;;  %1065 = vrot.lane.b32.xlu1 %v3346_v16, %s2754_s14 }
 0x377   :  { %1121 = vrot.lane.b32.xlu0 %v3313_v11, %s2756_s18  ;;  %1103 = vrot.lane.b32.xlu1 %v3313_v11, %s2755_s15 }
 0x37b   :  { %1157 = vrot.lane.b32.xlu0 %v3313_v11, %s2759_s20  ;;  %1139 = vrot.lane.b32.xlu1 %v3313_v11, %s2757_s19 }
 0x3ad   :  { %v2678_v49 = vpop.permute.xlu0 %2677  ;;  %v2673_v29 = vpop.permute.xlu1 %2672 }
 0x3ae   :  { %v2680_v55 = vunpack.i.h.bf16 %v2678_v49  ;;  %v2679_v50 = vunpack.i.l.bf16 %v2678_v49  ;;  %v2675_v53 = vunpack.i.h.bf16 %v2673_v29  ;;  %v2674_v58 = vunpack.i.l.bf16 %v2673_v29 }
 0x3b0   :  { %v1037_v31 = vsel %vm3786_vm8, %v2674_v58, %v2675_v53  ;;  %v1055_v33 = vsel %vm3787_vm15, %v2679_v50, %v2680_v55  ;;  %vm3802_vm8 = vcmp.lt.s32.totalorder %v2898_v14, 127 }
 0x3b1   :  { %v3388_v4 = vpop.permute.xlu0 %2687  ;;  %v3390_v3 = vpop.permute.xlu1 %2682  ;;  %v2444_v8 = vpack.c.bf16 %v1055_v33, %v1037_v31  ;;  %vm3803_vm15 = vmmov %vm3802_vm8 }
 0x3b2   :  { %v2690_v1 = vunpack.i.h.bf16 %v3388_v4  ;;  %v2689_v9 = vunpack.i.l.bf16 %v3388_v4  ;;  %v2685_v22 = vunpack.i.h.bf16 %v3390_v3  ;;  %v2684_v2 = vunpack.i.l.bf16 %v3390_v3 }
 0x3b3   :  { %2445 = vmatprep.subr.bf16.mxu1 %v2444_v8 }
 0x3b4   :  { %v1056_v32 = vsel %vm3788_vm6, %v2689_v9, %v2679_v50  ;;  %v1038_v34 = vsel %vm3789_vm7, %v2684_v2, %v2674_v58  ;;  %v1054_v35 = vsel %vm3790_vm4, %v2680_v55, %v2690_v1  ;;  %v1036_v6 = vsel %vm3791_vm5, %v2675_v53, %v2685_v22  ;;  %vm3804_vm6 = vmmov %vm3802_vm8 }
 0x3b5   :  { %v2446_v0 = vpack.c.bf16 %v1056_v32, %v1038_v34  ;;  %v3408_v38 = vpop.permute.xlu0 %1045  ;;  %v3410_v40 = vpop.permute.xlu1 %1027  ;;  %v2462_v48 = vpack.c.bf16 %v1054_v35, %v1036_v6  ;;  %vm3805_vm7 = vmmov %vm3804_vm6  ;;  %vm3806_vm4 = vcmp.lt.s32.totalorder %v2898_v14, 111  ;;  %vm3807_vm5 = vcmp.lt.s32.totalorder %v2898_v14, 110 }
 0x3b6   :  { %v1053_v41 = vsel %vm3792_vm9, %v2690_v1, %v3408_v38  ;;  %v1035_v45 = vsel %vm3793_vm10, %v2685_v22, %v3410_v40  ;;  %vm3808_vm9 = vmmov %vm3806_vm4 }
 0x3b7   :  { %v2460_v47 = vpack.c.bf16 %v1053_v41, %v1035_v45  ;;  %2447 = vmatpush1.bf16.msra.mxu1 %v2446_v0  ;;  %vm3809_vm10 = vmmov %vm3807_vm5 }
 0x3b9   :  { %v2698_v51 = vpop.permute.xlu0 %2697  ;;  %v2693_v56 = vpop.permute.xlu1 %2692  ;;  %2461 = vmatprep.subr.bf16.mxu0 %v2460_v47 }
 0x3ba   :  { %v2700_v57 = vunpack.i.h.bf16 %v2698_v51  ;;  %v2699_v59 = vunpack.i.l.bf16 %v2698_v51  ;;  %v2695_v60 = vunpack.i.h.bf16 %v2693_v56  ;;  %v2694_v61 = vunpack.i.l.bf16 %v2693_v56  ;;  %2463 = vmatpush1.bf16.msra.mxu0 %v2462_v48 }
 0x3bc   :  { %v1073_v62 = vsel %vm3794_vm11, %v2694_v61, %v2695_v60  ;;  %v1091_v5 = vsel %vm3795_vm12, %v2699_v59, %v2700_v57  ;;  %vm3810_vm11 = vmmov %vm3807_vm5 }
 0x3bd   :  { %v3422_v7 = vpop.permute.xlu0 %2707  ;;  %v3424_v17 = vpop.permute.xlu1 %2702  ;;  %v2448_v19 = vpack.c.bf16 %v1091_v5, %v1073_v62  ;;  %vm3811_vm12 = vmmov %vm3806_vm4 }
 0x3be   :  { %v2710_v21 = vunpack.i.h.bf16 %v3422_v7  ;;  %v2709_v24 = vunpack.i.l.bf16 %v3422_v7  ;;  %v2705_v18 = vunpack.i.h.bf16 %v3424_v17  ;;  %v2704_v42 = vunpack.i.l.bf16 %v3424_v17 }
 0x3bf   :  { %2449 = vmatprep.subr.bf16.mxu1 %v2448_v19 }
 0x3c0   :  { %v1092_v25 = vsel %vm3796_vm3, %v2709_v24, %v2699_v59  ;;  %v1074_v52 = vsel %vm3797_vm13, %v2704_v42, %v2694_v61  ;;  %v1090_v26 = vsel %vm3798_vm14, %v2700_v57, %v2710_v21  ;;  %v1072_v12 = vsel %vm3799_vm0, %v2695_v60, %v2705_v18  ;;  %vm3812_vm3 = vmmov %vm3807_vm5 }
 0x3c1   :  { %v2450_v15 = vpack.c.bf16 %v1092_v25, %v1074_v52  ;;  %v3442_v30 = vpop.permute.xlu0 %1081  ;;  %v3444_v28 = vpop.permute.xlu1 %1063  ;;  %v2466_v55 = vpack.c.bf16 %v1090_v26, %v1072_v12  ;;  %vm3813_vm13 = vmmov %vm3806_vm4  ;;  %vm3814_vm14 = vcmp.lt.s32.totalorder %v2898_v14, 109 }
 0x3c2   :  { %v1089_v46 = vsel %vm3800_vm1, %v2710_v21, %v3442_v30  ;;  %v1071_v49 = vsel %vm3801_vm2, %v2705_v18, %v3444_v28  ;;  %vm3815_vm0 = vmmov %vm3814_vm14  ;;  %vm3816_vm1 = vcmask 588800  }
 0x3c3   :  { %v2464_v29 = vpack.c.bf16 %v1089_v46, %v1071_v49  ;;  %2451 = vmatpush1.bf16.msra.mxu1 %v2450_v15  ;;  %vm3817_vm2 = vmmov %vm3815_vm0 }
 0x3c5   :  { %v3452_v50 = vpop.permute.xlu0 %2717  ;;  %v2713_v53 = vpop.permute.xlu1 %2712  ;;  %2465 = vmatprep.subr.bf16.mxu0 %v2464_v29 }
 0x3c6   :  { %v2720_v58 = vunpack.i.h.bf16 %v3452_v50  ;;  %v2719_v31 = vunpack.i.l.bf16 %v3452_v50  ;;  %v2715_v33 = vunpack.i.h.bf16 %v2713_v53  ;;  %v2714_v8 = vunpack.i.l.bf16 %v2713_v53  ;;  %2467 = vmatpush1.bf16.msra.mxu0 %v2466_v55 }
 0x3c8   :  { %v1109_v1 = vsel %vm3802_vm8, %v2719_v31, %v2714_v8  ;;  %v1108_v22 = vsel %vm3803_vm15, %v2714_v8, %v2715_v33  ;;  %v1107_v32 = vsel %vm3804_vm6, %v2715_v33, %v2720_v58  ;;  %vm3818_vm8 = vmmov %vm3815_vm0  ;;  %vm3820_vm6 = vcmp.lt.s32.totalorder %v2898_v14, 18 }
 0x3c9   :  { %v2454_v34 = vpack.c.bf16 %v1109_v1, %v3304_v20  ;;  %v2723_v35 = vpop.permute.xlu0 %2722  ;;  %v3465_v6 = vpop.permute.xlu1 %1101  ;;  %v2452_v0 = vpack.c.bf16 %v1108_v22, %v3307_v39  ;;  %v2470_v47 = vpack.c.bf16 %v1107_v32, %v3310_v54  ;;  %v3517_v22 = vld [vmem:[%s3770_s2] sm:$0xff]  ;;  %vm3819_vm15 = vmmov %vm3816_vm1 }
 0x3ca   :  { %v1106_v41 = vsel %vm3805_vm7, %v2720_v58, %v3465_v6  ;;  %v2725_v48 = vunpack.i.h.bf16 %v2723_v35  ;;  %v2724_v51 = vunpack.i.l.bf16 %v2723_v35  ;;  %vm3821_vm7 = vmmov %vm3820_vm6 }
 0x3cb   :  { %v2468_v45 = vpack.c.bf16 %v1106_v41, %v3324_v27  ;;  %2453 = vmatprep.subr.bf16.mxu1 %v2452_v0 }
 0x3cc   :  { %2455 = vmatpush1.bf16.msra.mxu1 %v2454_v34  ;;  %v1126_v60 = vsel %vm3806_vm4, %v2724_v51, %v2725_v48  ;;  %vm3822_vm4 = vcmp.lt.s32.totalorder %v2898_v14, 19 }
 0x3cd   :  { %v3473_v56 = vpop.permute.xlu0 %2732  ;;  %v2728_v20 = vpop.permute.xlu1 %2727  ;;  %2469 = vmatprep.subr.bf16.mxu0 %v2468_v45 }
 0x3ce   :  { %v2730_v57 = vunpack.i.h.bf16 %v2728_v20  ;;  %v2729_v59 = vunpack.i.l.bf16 %v2728_v20  ;;  %2471 = vmatpush1.bf16.msra.mxu0 %v2470_v47  ;;  %v2734_v39 = vunpack.i.l.bf16 %v3473_v56  ;;  %v2735_v21 = vunpack.i.h.bf16 %v3473_v56 }
 0x3d0   :  { %v1144_v27 = vsel %vm3807_vm5, %v2729_v59, %v2730_v57  ;;  %v1127_v18 = vsel %vm3808_vm9, %v2734_v39, %v2724_v51  ;;  %v1125_v29 = vsel %vm3813_vm13, %v2725_v48, %v2735_v21  ;;  %vm3823_vm5 = vmmov %vm3822_vm4  ;;  %vm3824_vm9 = vcmp.lt.s32.totalorder %v2898_v14, 1 }
 0x3d1   :  { %v3480_v61 = vpop.permute.xlu0 %1119  ;;  %v3482_v54 = vpop.permute.xlu1 %2737  ;;  %v2456_v62 = vpack.c.bf16 %v1144_v27, %v1126_v60 }
 0x3d2   :  { %v2740_v5 = vunpack.i.h.bf16 %v3482_v54  ;;  %v2739_v19 = vunpack.i.l.bf16 %v3482_v54  ;;  %v1124_v46 = vsel %vm3811_vm12, %v2735_v21, %v3480_v61 }
 0x3d3   :  { %2457 = vmatprep.subr.bf16.mxu1 %v2456_v62 }
 0x3d4   :  { %v1145_v25 = vsel %vm3809_vm10, %v2739_v19, %v2729_v59  ;;  %v1143_v52 = vsel %vm3810_vm11, %v2730_v57, %v2740_v5  ;;  %vm3825_vm10 = vmmov %vm3824_vm9  ;;  %vm3826_vm11 = vcmp.lt.s32.totalorder %v2898_v14, 17 }
 0x3d5   :  { %v2458_v26 = vpack.c.bf16 %v1145_v25, %v1127_v18  ;;  %v1150_v12 = vpop.permute.xlu0 %1149  ;;  %v3497_v15 = vpop.permute.xlu1 %1137  ;;  %v2474_v53 = vpack.c.bf16 %v1143_v52, %v1125_v29  ;;  %vm3827_vm12 = vmmov %vm3826_vm11 }
 0x3d6   :  { %v1142_v49 = vsel %vm3812_vm3, %v2740_v5, %v3497_v15  ;;  %vm3828_vm3 = vcmp.lt.s32.totalorder %v2898_v14, 127 }
 0x3d7   :  { %v2472_v55 = vpack.c.bf16 %v1142_v49, %v1124_v46  ;;  %2459 = vmatpush1.bf16.msra.mxu1 %v2458_v26  ;;  %vm3829_vm13 = vmmov %vm3828_vm3 }
 0x3d9   :  { %v3507_v58 = vpop.permute.xlu0 %1147  ;;  %v1152_v33 = vpop.permute.xlu1 %1151  ;;  %2473 = vmatprep.subr.bf16.mxu0 %v2472_v55 }
 0x3da   :  { %v1163_v8 = vsel %vm3814_vm14, %v3507_v58, %v1150_v12  ;;  %2475 = vmatpush1.bf16.msra.mxu0 %v2474_v53  ;;  %v1162_v1 = vsel %vm3815_vm0, %v1150_v12, %v1152_v33  ;;  %vm3830_vm14 = vcmp.lt.s32.totalorder %v2898_v14, 111 }
 0x3db   :  { %1184 = vmatprep.subr.mxu1 %v1162_v1  ;;  %vm3831_vm0 = vmmov %vm3830_vm14 }
 0x3dc   :  { %1185 = vmatpush1.msra.mxu1 %v1163_v8 }
 0x3dd   :  { %v1156_v32 = vpop.permute.xlu0 %1155  ;;  %v1154_v34 = vpop.permute.xlu1 %1153  ;;  %1877 = vmatmul.mubr.msk.f32.vlgmr.msra.gmra.mrb[8].mxu1 %vm3816_vm1, %v3517_v22  ;;  %vm3832_vm1 = vcmp.lt.s32.totalorder %v2898_v14, 110 }
 0x3de   :  { %v1161_v35 = vsel %vm3817_vm2, %v1152_v33, %v1154_v34  ;;  %v1160_v0 = vsel %vm3818_vm8, %v1154_v34, %v1156_v32  ;;  %1374 = vmatprep.mubr.f32.mxu1 %v2758_v10  ;;  %vm3833_vm2 = vmmov %vm3832_vm1 }
 0x3df   :  { %1255 = vmatprep.subr.mxu0 %v1160_v0 }
 0x3e0   :  { %1256 = vmatpush1.msra.mxu0 %v1161_v35 }
 0x3e1   :  { %v1048_v41 = vpop.permute.xlu0 %1047  ;;  %v1030_v45 = vpop.permute.xlu1 %1029  ;;  %1878 = vmatmul.mubr.msk.f32.vlgmr.msra.gmra.mrb[10].mxu0 %vm3819_vm15, %v3517_v22  ;;  %2492 = vmatprep.subr.bf16.mxu0 %v2760_v23  ;;  %vm3834_vm15 = vmmov %vm3818_vm8 }
 0x3e2   :  { %v1051_v47 = vsel %vm3820_vm6, %v1048_v41, %v2689_v9  ;;  %v1052_v48 = vsel %vm3821_vm7, %v3408_v38, %v1048_v41  ;;  %v1033_v10 = vsel %vm3822_vm4, %v1030_v45, %v2684_v2  ;;  %v1034_v51 = vsel %vm3823_vm5, %v3410_v40, %v1030_v45  ;;  %2493 = vmatpush3.bf16.msra.mxu0 %v2760_v23 }
 0x3e3   :  { %v2476_v20 = vpack.c.bf16 %v1051_v47, %v1033_v10  ;;  %v2478_v4 = vpack.c.bf16 %v1052_v48, %v1034_v51  ;;  %2494 = vmatprep.subr.bf16.mxu0 %v2760_v23  ;;  %vm3835_vm6 = vcmask 588800  }
 0x3e5   :  { %v1084_v9 = vpop.permute.xlu0 %1083  ;;  %v1066_v57 = vpop.permute.xlu1 %1065  ;;  %2477 = vmatprep.subr.bf16.mxu1 %v2476_v20 }
 0x3e6   :  { %v1087_v3 = vsel %vm3824_vm9, %v1084_v9, %v2709_v24  ;;  %v1088_v2 = vsel %vm3825_vm10, %v3442_v30, %v1084_v9  ;;  %v1069_v38 = vsel %vm3826_vm11, %v1066_v57, %v2704_v42  ;;  %v1070_v40 = vsel %vm3827_vm12, %v3444_v28, %v1066_v57  ;;  %2479 = vmatpush1.bf16.msra.mxu1 %v2478_v4 }
 0x3e7   :  { %v2480_v59 = vpack.c.bf16 %v1087_v3, %v1069_v38  ;;  %v2482_v60 = vpack.c.bf16 %v1088_v2, %v1070_v40  ;;  %2495 = vmatpush3.bf16.msra.mxu0 %v2760_v23  ;;  %v1817_v40 = vld [vmem:[%s3771_s5] sm:$0xff] }
 0x3e8   :  { %2496 = vmatprep.subr.bf16.mxu0 %v2760_v23 }
 0x3e9   :  { %v1122_v7 = vpop.permute.xlu0 %1121  ;;  %v1104_v24 = vpop.permute.xlu1 %1103  ;;  %2481 = vmatprep.subr.bf16.mxu1 %v2480_v59 }
 0x3ea   :  { %v1105_v17 = vsel %vm3828_vm3, %v3465_v6, %v1104_v24  ;;  %v1110_v42 = vsel %vm3829_vm13, %v1104_v24, %v2719_v31  ;;  %2483 = vmatpush1.bf16.msra.mxu1 %v2482_v60  ;;  %v1123_v6 = vsel %vm3830_vm14, %v3480_v61, %v1122_v7  ;;  %v1128_v50 = vsel %vm3831_vm0, %v1122_v7, %v2734_v39  ;;  %v1821_v7 = vld [vmem:[%s3772_s6] sm:$0xff] }
 0x3eb   :  { %v2484_v30 = vpack.c.bf16 %v1110_v42, %v3313_v11  ;;  %v2486_v28 = vpack.c.bf16 %v1105_v17, %v3346_v16  ;;  %2497 = vmatpush3.bf16.msra.mxu0 %v2760_v23 }
 0x3ec   :  { %2498 = vmatprep.subr.bf16.mxu0 %v2760_v23 }
 0x3ed   :  { %v1140_v27 = vpop.permute.xlu1 %1139  ;;  %2485 = vmatprep.subr.bf16.mxu1 %v2484_v30  ;;  %v1158_v31 = vpop.permute.xlu0 %1157 }
 0x3ee   :  { %v1141_v11 = vsel %vm3832_vm1, %v3497_v15, %v1140_v27  ;;  %v1146_v16 = vsel %vm3833_vm2, %v1140_v27, %v2739_v19  ;;  %2487 = vmatpush1.bf16.msra.mxu1 %v2486_v28  ;;  %v1164_v56 = vsel %vm3818_vm8, %v1158_v31, %v3507_v58  ;;  %v1159_v39 = vsel %vm3834_vm15, %v1156_v32, %v1158_v31 }
 0x3ef   :  { %v2488_v62 = vpack.c.bf16 %v1146_v16, %v1128_v50  ;;  %v2490_v5 = vpack.c.bf16 %v1141_v11, %v1123_v6  ;;  %2499 = vmatpush3.bf16.msra.mxu0 %v2760_v23 }
 0x3f0   :  { %2500 = vmatprep.subr.bf16.mxu0 %v2760_v23 }
 0x3f1   :  { %2489 = vmatprep.subr.bf16.mxu1 %v2488_v62 }
 0x3f2   :  { %2491 = vmatpush1.bf16.msra.mxu1 %v2490_v5 }
 0x3f3   :  { %1326 = vmatprep.subr.mxu1 %v1164_v56  ;;  %2501 = vmatpush3.bf16.msra.mxu0 %v2760_v23 }
 0x3f4   :  { %2502 = vmatprep.subr.bf16.mxu0 %v2760_v23 }
 0x3f6   :  { %1327 = vmatpush1.msra.mxu1 %v1159_v39 }
 0x3f7   :  { %1879 = vmatmul.mubr.msk.f32.vlgmr.msra.gmra.mrb[10].mxu1 %vm3835_vm6, %v3517_v22  ;;  %2508 = vmatprep.subr.bf16.mxu1 %v2760_v23 }
 0x3f8   :  { %2509 = vmatpush3.bf16.msra.mxu1 %v2760_v23  ;;  %2503 = vmatpush3.bf16.msra.mxu0 %v2760_v23 }
 0x3f9   :  { %2510 = vmatprep.subr.bf16.mxu1 %v2760_v23  ;;  %2504 = vmatprep.subr.bf16.mxu0 %v2760_v23 }
 0x3fc   :  { %2511 = vmatpush3.bf16.msra.mxu1 %v2760_v23  ;;  %2505 = vmatpush3.bf16.msra.mxu0 %v2760_v23 }
 0x3fd   :  { %2512 = vmatprep.subr.bf16.mxu1 %v2760_v23  ;;  %2506 = vmatprep.subr.bf16.mxu0 %v2760_v23 }
 0x400   :  { %2513 = vmatpush3.bf16.msra.mxu1 %v2760_v23  ;;  %2507 = vmatpush3.bf16.msra.mxu0 %v2760_v23 }
 0x401   :  { %2514 = vmatprep.subr.bf16.mxu1 %v2760_v23  ;;  %2524 = vmatprep.subr.bf16.mxu0 %v2760_v23 }
 0x404   :  { %2515 = vmatpush3.bf16.msra.mxu1 %v2760_v23 }
 0x405   :  { %2516 = vmatprep.subr.bf16.mxu1 %v2760_v23 }
 0x408   :  { %2517 = vmatpush3.bf16.msra.mxu1 %v2760_v23 }
 0x409   :  { %2518 = vmatprep.subr.bf16.mxu1 %v2760_v23 }
 0x40c   :  { %2519 = vmatpush3.bf16.msra.mxu1 %v2760_v23 }
 0x40d   :  { %2520 = vmatprep.subr.bf16.mxu1 %v2760_v23 }
 0x410   :  { %2521 = vmatpush3.bf16.msra.mxu1 %v2760_v23 }
 0x411   :  { %2522 = vmatprep.subr.bf16.mxu1 %v2760_v23 }
 0x414   :  { %2523 = vmatpush3.bf16.msra.mxu1 %v2760_v23 }
 0x415   :  { %2540 = vmatprep.subr.bf16.mxu1 %v2760_v23 }
 0x4b0   :  { %v1234_v14 = vpop.f32.mrb[8].mxu1 }
 0x4b1   :  { %v3621_v61 = vmul.f32 %v3173_v36, %v1234_v14  ;;  %v1236_v54 = vpop.f32.mrb[9].mxu1 }
 0x4b2   :  { %v3624_v19 = vmul.f32 %v3176_v37, %v1236_v54 }
 0x4b4   :  { %v1305_v21 = vpop.f32.mrb[10].mxu0  ;;  %1451 = vmatprep.mubr.f32.mxu0 %v3624_v19  ;;  %v1598_v36 = vmul.f32 %v3624_v19, %v3624_v19 }
 0x4b5   :  { %v1307_v18 = vpop.f32.mrb[11].mxu0  ;;  %1452 = vmatmul.mubr.f32.vlgmr.msra.gmra.mrb[12].mxu0 %v3621_v61  ;;  %v3633_v52 = vmul.f32 %v3188_v44, %v1305_v21 }
 0x4b6   :  { %v3629_v25 = vmul.f32 %v3185_v43, %v1307_v18  ;;  %2525 = vmatpush3.bf16.msra.mxu0 %v2760_v23  ;;  %v2747_v18 = vld [vmem:[%s3766_s0 + $0x10] sm:$0xff] }
 0x4b7   :  { %2526 = vmatprep.subr.bf16.mxu0 %v2760_v23  ;;  %v1599_v15 = vmul.f32 %v3633_v52, %v3633_v52 }
 0x4b8   :  { %1521 = vmatprep.mubr.f32.mxu1 %v3629_v25 }
 0x4b9   :  { %1522 = vmatmul.mubr.f32.vlgmr.msra.gmra.mrb[12].mxu1 %v3633_v52 }
 0x4ba   :  { %2527 = vmatpush3.bf16.msra.mxu0 %v2760_v23  ;;  %2541 = vmatpush3.bf16.msra.mxu1 %v2760_v23 }
 0x4bb   :  { %1667 = vmatprep.mubr.f32.mxu1 %v1598_v36  ;;  %2528 = vmatprep.subr.bf16.mxu0 %v2760_v23 }
 0x4bc   :  { %2542 = vmatprep.subr.bf16.mxu1 %v2760_v23 }
 0x4be   :  { %2529 = vmatpush3.bf16.msra.mxu0 %v2760_v23  ;;  %2543 = vmatpush3.bf16.msra.mxu1 %v2760_v23 }
 0x4bf   :  { %2530 = vmatprep.subr.bf16.mxu0 %v2760_v23  ;;  %2544 = vmatprep.subr.bf16.mxu1 %v2760_v23 }
 0x4c2   :  { %2531 = vmatpush3.bf16.msra.mxu0 %v2760_v23  ;;  %2545 = vmatpush3.bf16.msra.mxu1 %v2760_v23 }
 0x4c3   :  { %2532 = vmatprep.subr.bf16.mxu0 %v2760_v23  ;;  %2546 = vmatprep.subr.bf16.mxu1 %v2760_v23 }
 0x4c6   :  { %2533 = vmatpush3.bf16.msra.mxu0 %v2760_v23  ;;  %2547 = vmatpush3.bf16.msra.mxu1 %v2760_v23 }
 0x4c7   :  { %2534 = vmatprep.subr.bf16.mxu0 %v2760_v23  ;;  %2548 = vmatprep.subr.bf16.mxu1 %v2760_v23 }
 0x4ca   :  { %2535 = vmatpush3.bf16.msra.mxu0 %v2760_v23  ;;  %2549 = vmatpush3.bf16.msra.mxu1 %v2760_v23  ;;  %v1376_v37 = vpop.f32.mrb[10].mxu1 }
 0x4cb   :  { %2536 = vmatprep.subr.bf16.mxu0 %v2760_v23  ;;  %2550 = vmatprep.subr.bf16.mxu1 %v2760_v23  ;;  %v1378_v43 = vpop.f32.mrb[11].mxu1  ;;  %v3669_v26 = vmul.f32 %v3235_v13, %v1376_v37  ;;  %v1597_v13 = vmul.f32 %v3621_v61, %v3621_v61  ;;  %v2749_v37 = vld [vmem:[%s3766_s0 + $0x20] sm:$0xff] }
 0x4cc   :  { %v3661_v44 = vmul.f32 %v3223_v63, %v1378_v43  ;;  %v1600_v63 = vmul.f32 %v3629_v25, %v3629_v25 }
 0x4cd   :  { %v1601_v46 = vmul.f32 %v3669_v26, %v3669_v26 }
 0x4ce   :  { %2537 = vmatpush3.bf16.msra.mxu0 %v2760_v23  ;;  %2551 = vmatpush3.bf16.msra.mxu1 %v2760_v23  ;;  %v1602_v12 = vmul.f32 %v3661_v44, %v3661_v44 }
 0x4cf   :  { %2538 = vmatprep.subr.bf16.mxu0 %v2760_v23  ;;  %2552 = vmatprep.subr.bf16.mxu1 %v2760_v23 }
 0x4d0   :  { %1591 = vmatprep.mubr.f32.mxu0 %v3661_v44 }
 0x4d2   :  { %2539 = vmatpush3.bf16.msra.mxu0 %v2760_v23  ;;  %2553 = vmatpush3.bf16.msra.mxu1 %v2760_v23 }
 0x4d3   :  { %2554 = vmatprep.subr.bf16.mxu1 %v2760_v23  ;;  %2556 = vmatprep.subr.bf16.mxu0 %v2760_v23 }
 0x4d5   :  { %1592 = vmatmul.mubr.f32.vlgmr.msra.gmra.mrb[14].mxu0 %v3669_v26 }
 0x4d6   :  { %2555 = vmatpush3.bf16.msra.mxu1 %v2760_v23  ;;  %2557 = vmatpush3.bf16.msra.mxu0 %v2760_v23 }
 0x4d7   :  { %1737 = vmatprep.mubr.f32.mxu0 %v1600_v63  ;;  %2558 = vmatprep.subr.bf16.mxu0 %v2760_v23 }
 0x4d8   :  { %2572 = vmatprep.subr.bf16.mxu1 %v2760_v23 }
 0x4d9   :  { %1668 = vmatmul.mubr.f32.vlgmr.msra.gmra.mrb[14].mxu1 %v1597_v13 }
 0x4da   :  { %2559 = vmatpush3.bf16.msra.mxu0 %v2760_v23  ;;  %2573 = vmatpush3.bf16.msra.mxu1 %v2760_v23 }
 0x4db   :  { %1807 = vmatprep.mubr.f32.mxu1 %v1602_v12  ;;  %2560 = vmatprep.subr.bf16.mxu0 %v2760_v23 }
 0x4dc   :  { %2574 = vmatprep.subr.bf16.mxu1 %v2760_v23 }
 0x4de   :  { %2561 = vmatpush3.bf16.msra.mxu0 %v2760_v23  ;;  %2575 = vmatpush3.bf16.msra.mxu1 %v2760_v23 }
 0x4df   :  { %2562 = vmatprep.subr.bf16.mxu0 %v2760_v23  ;;  %2576 = vmatprep.subr.bf16.mxu1 %v2760_v23 }
 0x4e2   :  { %2563 = vmatpush3.bf16.msra.mxu0 %v2760_v23  ;;  %2577 = vmatpush3.bf16.msra.mxu1 %v2760_v23 }
 0x4e3   :  { %2564 = vmatprep.subr.bf16.mxu0 %v2760_v23  ;;  %2578 = vmatprep.subr.bf16.mxu1 %v2760_v23 }
 0x4e6   :  { %2565 = vmatpush3.bf16.msra.mxu0 %v2760_v23  ;;  %2579 = vmatpush3.bf16.msra.mxu1 %v2760_v23 }
 0x4e7   :  { %2566 = vmatprep.subr.bf16.mxu0 %v2760_v23  ;;  %2580 = vmatprep.subr.bf16.mxu1 %v2760_v23 }
 0x4ea   :  { %2567 = vmatpush3.bf16.msra.mxu0 %v2760_v23  ;;  %2581 = vmatpush3.bf16.msra.mxu1 %v2760_v23 }
 0x4eb   :  { %2568 = vmatprep.subr.bf16.mxu0 %v2760_v23  ;;  %2582 = vmatprep.subr.bf16.mxu1 %v2760_v23 }
 0x4ee   :  { %2569 = vmatpush3.bf16.msra.mxu0 %v2760_v23  ;;  %2583 = vmatpush3.bf16.msra.mxu1 %v2760_v23 }
 0x4ef   :  { %2570 = vmatprep.subr.bf16.mxu0 %v2760_v23  ;;  %2584 = vmatprep.subr.bf16.mxu1 %v2760_v23 }
 0x4f2   :  { %2571 = vmatpush3.bf16.msra.mxu0 %v2760_v23  ;;  %2585 = vmatpush3.bf16.msra.mxu1 %v2760_v23 }
 0x4f3   :  { %2586 = vmatprep.subr.bf16.mxu1 %v2760_v23 }
 0x4f5   :  { %1738 = vmatmul.mubr.f32.vlgmr.msra.gmra.mrb[16].mxu0 %v1599_v15 }
 0x4f6   :  { %2587 = vmatpush3.bf16.msra.mxu1 %v2760_v23 }
 0x4f9   :  { %1808 = vmatmul.mubr.f32.vlgmr.msra.gmra.mrb[16].mxu1 %v1601_v46 }
 0x588   :  { %v2122_v49 = vpop.f32.mrb[12].mxu0 }
 0x589   :  { %v2123_v29 = vpop.f32.mrb[13].mxu0 }
 0x58a   :  { %v2124_v55 = vadd.f32 %v2123_v29, %v2122_v49 }
 0x58c   :  { %v2157_v53 = vpop.f32.mrb[12].mxu1 }
 0x58d   :  { %v2158_v58 = vpop.f32.mrb[13].mxu1 }
 0x58e   :  { %v2159_v33 = vadd.f32 %v2158_v58, %v2157_v53 }
 0x590   :  { %v1524_v8 = vadd.f32 %v2159_v33, %v2124_v55 }
 0x5a8   :  { %v2192_v1 = vpop.f32.mrb[14].mxu0 }
 0x5a9   :  { %v2193_v22 = vpop.f32.mrb[15].mxu0 }
 0x5aa   :  { %v2194_v32 = vadd.f32 %v2193_v22, %v2192_v1 }
 0x5ac   :  { %v1594_v34 = vadd.f32 %v2194_v32, %v1524_v8  ;;  %v2227_v35 = vpop.f32.mrb[14].mxu1 }
 0x5ad   :  { %v2228_v0 = vpop.f32.mrb[15].mxu1 }
 0x5ae   :  { %v2229_v41 = vadd.f32 %v2228_v0, %v2227_v35  ;;  %v1813_v20 = vmul.f32 0.001953125, %v1594_v34 }
 0x5b0   :  { %v1815_v57 = vmul.f32 %v1813_v20, %v1813_v20 }
 0x5c8   :  { %v2262_v45 = vpop.f32.mrb[16].mxu0 }
 0x5c9   :  { %v2263_v23 = vpop.f32.mrb[17].mxu0 }
 0x5ca   :  { %v2264_v47 = vadd.f32 %v2263_v23, %v2262_v45 }
 0x5cc   :  { %v1740_v48 = vadd.f32 %v2264_v47, %v2229_v41  ;;  %v2297_v10 = vpop.f32.mrb[16].mxu1 }
 0x5cd   :  { %v2298_v51 = vpop.f32.mrb[17].mxu1 }
 0x5ce   :  { %v2299_v4 = vadd.f32 %v2298_v51, %v2297_v10 }
 0x5d0   :  { %v1810_v9 = vadd.f32 %v2299_v4, %v1740_v48 }
 0x5d2   :  { %v1814_v3 = vmul.f32 0.001953125, %v1810_v9 }
 0x5d4   :  { %v1816_v2 = vsub.f32 %v1814_v3, %v1815_v57 }
 0x5d6   :  { %v1818_v38 = vadd.f32 1e-05, %v1816_v2 }
 0x5d8   :  { %2743 = vrsqrt.f32 %v1818_v38 }
 0x5e2   :  { %v2744_v59 = vpop.eup %2743 }
 0x5e3   :  { %v1820_v60 = vmul.f32 %v2744_v59, %v1817_v40 }
 0x5e5   :  { %1826 = vperm.xlu1 %2670, %v1820_v60   ;;  %v1822_v24 = vmul.f32 %v1820_v60, %v1813_v20 }
 0x5e7   :  { %v1823_v17 = vsub.f32 %v1821_v7, %v1822_v24 }
 0x5e9   :  { %1837 = vperm.xlu0 %2669, %v1823_v17  }
 0x664   :  { %v1827_v42 = vpop.permute.xlu1 %1826 }
 0x665   :  { %v1829_v30 = vmul.f32 %v1827_v42, %v3621_v61  ;;  %v1830_v28 = vmul.f32 %v1827_v42, %v3624_v19  ;;  %v1831_v27 = vmul.f32 %v1827_v42, %v3633_v52  ;;  %v1832_v6 = vmul.f32 %v1827_v42, %v3629_v25  ;;  %v2745_v61 = vld [vmem:[%s3766_s0] sm:$0xff]  ;;  %v2746_v19 = vld [vmem:[%s3766_s0 + $0x8] sm:$0xff]  ;;  %v2748_v52 = vld [vmem:[%s3766_s0 + $0x18] sm:$0xff] }
 0x666   :  { %v1833_v50 = vmul.f32 %v1827_v42, %v3669_v26  ;;  %v1834_v11 = vmul.f32 %v1827_v42, %v3661_v44  ;;  %v2750_v44 = vld [vmem:[%s3766_s0 + $0x28] sm:$0xff] }
 0x668   :  { %v1838_v16 = vpop.permute.xlu0 %1837 }
 0x669   :  { %v1840_v31 = vadd.f32 %v1838_v16, %v1829_v30  ;;  %v1841_v62 = vadd.f32 %v1838_v16, %v1830_v28  ;;  %v1842_v5 = vadd.f32 %v1838_v16, %v1831_v27  ;;  %v1843_v56 = vadd.f32 %v1838_v16, %v1832_v6 }
 0x66a   :  { %v1844_v39 = vadd.f32 %v1838_v16, %v1833_v50  ;;  %v1845_v14 = vadd.f32 %v1838_v16, %v1834_v11 }
 0x66b   :  { %v1846_v54 = vadd.f32 %v2745_v61, %v1840_v31  ;;  %v1847_v21 = vadd.f32 %v2746_v19, %v1841_v62  ;;  %v1848_v25 = vadd.f32 %v2747_v18, %v1842_v5  ;;  %v1849_v36 = vadd.f32 %v2748_v52, %v1843_v56 }
 0x66c   :  { %v1850_v43 = vadd.f32 %v2749_v37, %v1844_v39  ;;  %v1851_v26 = vadd.f32 %v2750_v44, %v1845_v14 }
 0x66d   :  { %v1852_v63 = vmax.f32 %v1846_v54, 0.0  ;;  %v1853_v13 = vmax.f32 %v1847_v21, 0.0  ;;  %v1854_v12 = vmax.f32 %v1848_v25, 0.0  ;;  %v1855_v15 = vmax.f32 %v1849_v36, 0.0 }
 0x66e   :  { %v1856_v46 = vmax.f32 %v1850_v43, 0.0  ;;  %v1857_v49 = vmax.f32 %v1851_v26, 0.0 }
 0x66f   :  { %1858 = vst [vmem:[%s3773_s7] sm:$0xff] %v1852_v63  ;;  %1859 = vst [vmem:[%s3773_s7 + $0x8] sm:$0xff] %v1853_v13 }
 0x670   :  { %1860 = vst [vmem:[%s3773_s7 + $0x10] sm:$0xff] %v1854_v12  ;;  %1861 = vst [vmem:[%s3773_s7 + $0x18] sm:$0xff] %v1855_v15 }
 0x671   :  { %1862 = vst [vmem:[%s3773_s7 + $0x20] sm:$0xff] %v1856_v46  ;;  %1863 = vst [vmem:[%s3773_s7 + $0x28] sm:$0xff] %v1857_v49 }

</bundles_post_ra>
